<compile_context>
chip_gen: v5e
topology: v5e:2x2
jax: 0.10.0
libtpu: 0.0.40
codegen_flags: <defaults>
</compile_context>

<pallas_src>
import functools

import jax
import jax.numpy as jnp
from jax.experimental import pallas as pl
from jax.experimental.pallas import tpu as pltpu

EPS = 1e-5  # nn.BatchNorm2d default


# ------------------------------- fused kernel -------------------------------

def _res_block_kernel(*refs, initial, fused_kh, compute_dtype):
    if initial:
        (xt_ref, xm_ref, xb_ref, w1_ref, s1_ref, sh1_ref, w2_ref, s2_ref,
         sh2_ref, w3_ref, s3_ref, sh3_ref, w4_ref, s4_ref, sh4_ref,
         o_ref, hext_ref) = refs
    else:
        (xt_ref, xm_ref, xb_ref, w1_ref, s1_ref, sh1_ref, w2_ref, s2_ref,
         sh2_ref, w3_ref, s3_ref, sh3_ref, o_ref, hext_ref) = refs
        w4_ref = s4_ref = sh4_ref = None

    f32 = jnp.float32
    TH, W, Cin = xm_ref.shape
    Cout = o_ref.shape[-1]
    Ch = w1_ref.shape[1]
    rows = TH * W

    r = pl.program_id(1)
    R = pl.num_programs(1)

    # ---- conv1 (1x1) + bn1 + relu on the (TH+2)-row halo slab --------------
    w1 = w1_ref[...]                      # already in compute_dtype (wrapper cast)
    s1 = s1_ref[...]
    sh1 = sh1_ref[...]

    def conv1_bn_relu(x2d):
        z = jnp.dot(x2d.astype(compute_dtype), w1, preferred_element_type=f32)
        z = jnp.maximum(z * s1 + sh1, 0.0)        # f32 epilogue
        return z.astype(hext_ref.dtype)           # store hidden in compute_dtype

    # Interior x rows are loaded once and reused by the identity branch below.
    x_mid = xm_ref[...].reshape(rows, Cin)
    hext_ref[pl.ds(W, rows)] = conv1_bn_relu(x_mid)

    zero_row = jnp.zeros((W, Ch), hext_ref.dtype)

    @pl.when(r == 0)                               # image top: zero halo
    def _():
        hext_ref[pl.ds(0, W)] = zero_row

    @pl.when(r > 0)                                # interior: real halo row
    def _():
        hext_ref[pl.ds(0, W)] = conv1_bn_relu(xt_ref[...].reshape(W, Cin))

    @pl.when(r == R - 1)                           # image bottom: zero halo
    def _():
        hext_ref[pl.ds((TH + 1) * W, W)] = zero_row

    @pl.when(r < R - 1)
    def _():
        hext_ref[pl.ds((TH + 1) * W, W)] = conv1_bn_relu(xb_ref[...].reshape(W, Cin))

    # ---- 3x3 conv (PHDConv2d) + bn2 + relu ---------------------------------
    def win(kh):
        # Hidden ext rows [kh, kh + TH): static, sublane-aligned slice of scratch.
        return hext_ref[pl.ds(kh * W, rows)]

    if fused_kh:
        # Fold the 3 kh taps into the contraction: 3 matmuls with K = 3*Ch
        # (fills the 256-deep MXU on v6e/v7x).  w2_ref is (3, 3*Ch, Ch), kw-major.
        lhs = jnp.concatenate([win(0), win(1), win(2)], axis=1)   # (rows, 3*Ch)

        def zpart(kw):
            return jnp.dot(lhs, w2_ref[kw], preferred_element_type=f32)
    else:
        # w2_ref is (9, Ch, Ch), index kh*3 + kw.
        def zpart(kw):
            acc = None
            for kh in range(3):
                p = jnp.dot(win(kh), w2_ref[kh * 3 + kw],
                            preferred_element_type=f32)
                acc = p if acc is None else acc + p
            return acc

    col = jax.lax.broadcasted_iota(jnp.int32, (rows, 1), 0) % W
    acc2 = zpart(1)                                # kw=1: same column
    # kw=0 reads column w-1 -> shift the partial down one flat row via the XLU;
    # the col>0 mask kills the single wrapped element.
    acc2 = acc2 + jnp.where(col > 0, pltpu.roll(zpart(0), shift=1, axis=0), 0.0)
    # kw=2 reads column w+1 -> roll by rows-1 (== -1, kept positive).
    acc2 = acc2 + jnp.where(col < W - 1,
                            pltpu.roll(zpart(2), shift=rows - 1, axis=0), 0.0)
    h2 = jnp.maximum(acc2 * s2_ref[...] + sh2_ref[...], 0.0)      # f32

    # ---- conv3 (1x1) + bn3, identity branch, add, relu ----------------------
    y = jnp.dot(h2.astype(compute_dtype), w3_ref[...], preferred_element_type=f32)
    y = y * s3_ref[...] + sh3_ref[...]

    if initial:
        ident = jnp.dot(x_mid.astype(compute_dtype), w4_ref[...],
                        preferred_element_type=f32)
        ident = ident * s4_ref[...] + sh4_ref[...]
    else:
        ident = x_mid.astype(f32)                  # requires Cin == Cout

    out = jnp.maximum(y + ident, 0.0)
    o_ref[...] = out.reshape(TH, W, Cout).astype(o_ref.dtype)


# ------------------------------ wrapper / glue -------------------------------

def fold_bn(conv_bias, gamma, beta, mean, var, eps=EPS):
    s = gamma / jnp.sqrt(var + eps)
    shift = (conv_bias - mean) * s + beta
    return s, shift


def _vmem_capacity_bytes():
    try:
        info = pltpu.get_tpu_info()
        cap = getattr(info, "vmem_capacity_bytes", None)
        if cap:
            return int(cap)
    except Exception:
        pass
    return 64 * 2 ** 20     # conservative fallback (v7x per-TC VMEM)


def _pick_row_tile(H, W, cin, ch, cout, io_bytes, cd_bytes, budget_bytes):
    """Largest divisor of H whose per-step working set fits the budget
    (prefers >= 2 row tiles so the grid has multiple parallel steps)."""
    divs = [d for d in range(1, H + 1) if H % d == 0]

    def work(th):
        return (2 * (th + 2) * W * cin * io_bytes      # x slab, double-buffered
                + 2 * th * W * cout * io_bytes         # output tile, double-buffered
                + (th + 2) * W * ch * cd_bytes         # hidden scratch
                + 4 * th * W * (4 * ch + 2 * cout))    # f32 temporaries (3x3 + epilogue)

    cands = [d for d in divs if d < H] or divs
    fitting = [d for d in cands if work(d) <= budget_bytes]
    return max(fitting) if fitting else min(cands)


def res_block_enc(x_nhwc, params, level, *, initial, compute_dtype=None,
                  row_tile=None):
    """Forward pass of ResBlock_enc (eval-mode BN).  x_nhwc: (N, H, W, Cin)."""
    del level  # TODO(synk): spherical padding level unused with the zero-pad approximation
    N, H, W, Cin = x_nhwc.shape
    Ch = params["w1"].shape[1]
    Cout = params["w3"].shape[1]
    if not initial and Cin != Cout:
        raise ValueError("initial=False requires in_channels == out_channels "
                         f"for the residual add (got {Cin} vs {Cout}).")
    # bf16 matmul inputs by default (MXU-native on v5e/v6e/v7x); accumulation
    # and BN/ReLU epilogues stay f32 inside the kernel.
    compute_dtype = compute_dtype or jnp.bfloat16

    cap = _vmem_capacity_bytes()
    io_b = jnp.dtype(x_nhwc.dtype).itemsize
    cd_b = jnp.dtype(compute_dtype).itemsize

    TH = row_tile or _pick_row_tile(
        H, W, Cin, Ch, Cout, io_b, cd_b,
        budget_bytes=max(6 * 2 ** 20, min(cap // 8, 16 * 2 ** 20)))
    assert H % TH == 0, (H, TH)
    R = H // TH

    fused_kh = (Ch % 128 == 0)     # lane-block concat is cheap only then

    s1, sh1 = fold_bn(params["b1"], params["g1"], params["be1"], params["m1"], params["v1"])
    s2, sh2 = fold_bn(params["b2"], params["g2"], params["be2"], params["m2"], params["v2"])
    s3, sh3 = fold_bn(params["b3"], params["g3"], params["be3"], params["m3"], params["v3"])

    w1 = params["w1"].astype(compute_dtype)
    w3 = params["w3"].astype(compute_dtype)
    if fused_kh:
        # kw-major, with the 3 kh taps stacked along the contraction dim.
        w2 = (params["w2"].reshape(3, 3, Ch, Ch).transpose(1, 0, 2, 3)
              .reshape(3, 3 * Ch, Ch).astype(compute_dtype))
        w2_spec = pl.BlockSpec((3, 3 * Ch, Ch), lambda n, r: (0, 0, 0))
    else:
        w2 = params["w2"].astype(compute_dtype)
        w2_spec = pl.BlockSpec((9, Ch, Ch), lambda n, r: (0, 0, 0))

    cst2 = lambda n, r: (0, 0)
    in_specs = [
        # Per-tile halo slab: 1 top-halo row, TH interior rows, 1 bottom-halo
        # row (clamped at the image edges; the kernel zeroes the halo there).
        pl.BlockSpec((None, 1, W, Cin),
                     lambda n, r: (n, jnp.maximum(r * TH - 1, 0), 0, 0)),
        pl.BlockSpec((None, TH, W, Cin), lambda n, r: (n, r, 0, 0)),
        pl.BlockSpec((None, 1, W, Cin),
                     lambda n, r: (n, jnp.minimum(r * TH + TH, H - 1), 0, 0)),
        pl.BlockSpec((Cin, Ch), cst2),
        pl.BlockSpec((1, Ch), cst2), pl.BlockSpec((1, Ch), cst2),
        w2_spec,
        pl.BlockSpec((1, Ch), cst2), pl.BlockSpec((1, Ch), cst2),
        pl.BlockSpec((Ch, Cout), cst2),
        pl.BlockSpec((1, Cout), cst2), pl.BlockSpec((1, Cout), cst2),
    ]
    args = [x_nhwc, x_nhwc, x_nhwc,
            w1, s1.reshape(1, Ch), sh1.reshape(1, Ch),
            w2, s2.reshape(1, Ch), sh2.reshape(1, Ch),
            w3, s3.reshape(1, Cout), sh3.reshape(1, Cout)]
    if initial:
        s4, sh4 = fold_bn(params["b4"], params["g4"], params["be4"],
                          params["m4"], params["v4"])
        in_specs += [pl.BlockSpec((Cin, Cout), cst2),
                     pl.BlockSpec((1, Cout), cst2), pl.BlockSpec((1, Cout), cst2)]
        args += [params["w4"].astype(compute_dtype),
                 s4.reshape(1, Cout), sh4.reshape(1, Cout)]

    # Generation-aware VMEM budget: actual estimate + 25%, capped well below
    # the physical capacity (leave >=16 MiB headroom for compiler scratch).
    wsize = Cin * Ch + 9 * Ch * Ch + Ch * Cout + (Cin * Cout if initial else 0)
    est = (2 * (TH + 2) * W * Cin * io_b
           + 2 * TH * W * Cout * io_b
           + (TH + 2) * W * Ch * cd_b
           + 2 * wsize * cd_b
           + 4 * TH * W * ((4 + (3 if fused_kh else 0)) * Ch + 2 * Cout))
    vmem_limit = int(min(max(1.25 * est, 32 * 2 ** 20), cap - 16 * 2 ** 20))
    vmem_limit = max(vmem_limit, 16 * 2 ** 20)

    kernel = functools.partial(_res_block_kernel, initial=initial,
                               fused_kh=fused_kh, compute_dtype=compute_dtype)
    return pl.pallas_call(
        kernel,
        out_shape=jax.ShapeDtypeStruct((N, H, W, Cout), x_nhwc.dtype),
        grid_spec=pltpu.PrefetchScalarGridSpec(
            num_scalar_prefetch=0,
            grid=(N, R),
            in_specs=in_specs,
            out_specs=pl.BlockSpec((None, TH, W, Cout), lambda n, r: (n, r, 0, 0)),
            scratch_shapes=[pltpu.VMEM(((TH + 2) * W, Ch), compute_dtype)],
        ),
        compiler_params=pltpu.CompilerParams(
            # Every (n, r) step is independent now (x slab is per-tile and the
            # scratch is fully rewritten each step), so both axes shard freely
            # across TensorCores on v7x.
            dimension_semantics=("parallel", "parallel"),
            vmem_limit_bytes=vmem_limit),
    )(*args)


def res_block_enc_nchw(x_nchw, params, level, *, initial, **kw):
    """PyTorch-layout convenience wrapper (keep the whole model NHWC if possible)."""
    x = jnp.transpose(x_nchw, (0, 2, 3, 1))
    out = res_block_enc(x, params, level, initial=initial, **kw)
    return jnp.transpose(out, (0, 3, 1, 2))


# ---------------------------- reference (plain JAX) ---------------------------

def reference(x, params, *, initial):
    def bn(z, g, be, m, v):
        return g * (z - m) / jnp.sqrt(v + EPS) + be

    ch = params["w1"].shape[1]
    z = jnp.einsum("nhwc,cd->nhwd", x, params["w1"]) + params["b1"]
    z = jax.nn.relu(bn(z, params["g1"], params["be1"], params["m1"], params["v1"]))
    zp = jnp.pad(z, ((0, 0), (1, 1), (1, 1), (0, 0)))
    w2 = params["w2"].reshape(3, 3, ch, ch)
    z2 = jax.lax.conv_general_dilated(
        zp, w2, (1, 1), "VALID",
        dimension_numbers=("NHWC", "HWIO", "NHWC")) + params["b2"]
    z2 = jax.nn.relu(bn(z2, params["g2"], params["be2"], params["m2"], params["v2"]))
    z3 = jnp.einsum("nhwc,cd->nhwd", z2, params["w3"]) + params["b3"]
    z3 = bn(z3, params["g3"], params["be3"], params["m3"], params["v3"])
    if initial:
        idn = jnp.einsum("nhwc,cd->nhwd", x, params["w4"]) + params["b4"]
        idn = bn(idn, params["g4"], params["be4"], params["m4"], params["v4"])
    else:
        idn = x
    return jax.nn.relu(z3 + idn)


# ----------------------------------- main ------------------------------------

def make_params(key, cin, ch, cout):
    ks = jax.random.split(key, 24)
    p = {}
    p["w1"] = 0.1 * jax.random.normal(ks[0], (cin, ch), jnp.float32)
    p["b1"] = 0.1 * jax.random.normal(ks[1], (ch,), jnp.float32)
    p["w2"] = 0.1 * jax.random.normal(ks[2], (9, ch, ch), jnp.float32)
    p["b2"] = 0.1 * jax.random.normal(ks[3], (ch,), jnp.float32)
    p["w3"] = 0.1 * jax.random.normal(ks[4], (ch, cout), jnp.float32)
    p["b3"] = 0.1 * jax.random.normal(ks[5], (cout,), jnp.float32)
    p["w4"] = 0.1 * jax.random.normal(ks[6], (cin, cout), jnp.float32)
    p["b4"] = 0.1 * jax.random.normal(ks[7], (cout,), jnp.float32)
    for i, c in zip((1, 2, 3, 4), (ch, ch, cout, cout)):
        p[f"g{i}"] = 1.0 + 0.05 * jax.random.normal(ks[6 + 2 * i], (c,), jnp.float32)
        p[f"be{i}"] = 0.05 * jax.random.normal(ks[7 + 2 * i], (c,), jnp.float32)
        p[f"m{i}"] = 0.02 * jnp.arange(c, dtype=jnp.float32) - 0.01 * c
        p[f"v{i}"] = 1.0 + 0.01 * jnp.arange(c, dtype=jnp.float32)
    return p


if __name__ == "__main__":
    key = jax.random.PRNGKey(0)
    kx, kp, kx2, kp2, kx3, kp3 = jax.random.split(key, 6)

    # Case 1: initial=True (projection shortcut), f32 matmuls for a tight check.
    N, H, W, CIN, HID, COUT = 2, 16, 16, 4, 8, 16
    x = jax.random.normal(kx, (N, H, W, CIN), jnp.float32)
    params = make_params(kp, CIN, HID, COUT)
    out = jax.block_until_ready(
        res_block_enc(x, params, level=0, initial=True, compute_dtype=jnp.float32))
    ref = reference(x, params, initial=True)
    if not jnp.allclose(out, ref, atol=2e-4, rtol=2e-4):
        raise AssertionError("initial=True: Pallas result does not match reference")

    # Case 2: initial=False (plain residual), in_channels == out_channels.
    x2 = jax.random.normal(kx2, (N, H, W, COUT), jnp.float32)
    params2 = make_params(kp2, COUT, HID, COUT)
    out2 = jax.block_until_ready(
        res_block_enc(x2, params2, level=0, initial=False, compute_dtype=jnp.float32))
    ref2 = reference(x2, params2, initial=False)
    if not jnp.allclose(out2, ref2, atol=2e-4, rtol=2e-4):
        raise AssertionError("initial=False: Pallas result does not match reference")

    # Case 3: lane-dense production-style channels (Ch = Cout = 128) with the
    # default bf16 matmuls and the kh-fused MXU contraction path.
    x3 = jax.random.normal(kx3, (N, H, W, 8), jnp.float32)
    params3 = make_params(kp3, 8, 128, 128)
    out3 = jax.block_until_ready(res_block_enc(x3, params3, level=0, initial=True))
    ref3 = reference(x3, params3, initial=True)
    rel = jnp.max(jnp.abs(out3 - ref3)) / (jnp.max(jnp.abs(ref3)) + 1e-6)
    if not (rel < 3e-2):
        raise AssertionError(f"bf16 lane-dense case: rel error {rel} too large")

    print("KERNEL_OK")
</pallas_src>

<mosaic_0001>
module attributes {stable_mosaic.version = 11 : i64} {
  func.func @_res_block_kernel(%arg0: i32, %arg1: i32, %arg2: memref<1x1x16x4xf32, #tpu.memory_space<vmem>>, %arg3: memref<1x8x16x4xf32, #tpu.memory_space<vmem>>, %arg4: memref<1x1x16x4xf32, #tpu.memory_space<vmem>>, %arg5: memref<4x8xf32, #tpu.memory_space<vmem>>, %arg6: memref<1x8xf32, #tpu.memory_space<vmem>>, %arg7: memref<1x8xf32, #tpu.memory_space<vmem>>, %arg8: memref<9x8x8xf32, #tpu.memory_space<vmem>>, %arg9: memref<1x8xf32, #tpu.memory_space<vmem>>, %arg10: memref<1x8xf32, #tpu.memory_space<vmem>>, %arg11: memref<8x16xf32, #tpu.memory_space<vmem>>, %arg12: memref<1x16xf32, #tpu.memory_space<vmem>>, %arg13: memref<1x16xf32, #tpu.memory_space<vmem>>, %arg14: memref<4x16xf32, #tpu.memory_space<vmem>>, %arg15: memref<1x16xf32, #tpu.memory_space<vmem>>, %arg16: memref<1x16xf32, #tpu.memory_space<vmem>>, %arg17: memref<1x8x16x16xf32, #tpu.memory_space<vmem>>, %arg18: memref<160x8xf32, #tpu.memory_space<vmem>>) attributes {dimension_semantics = [#tpu.dimension_semantics<parallel>, #tpu.dimension_semantics<parallel>], iteration_bounds = array<i64: 2, 2>, scalar_prefetch = 0 : i64, scratch_operands = 1 : i64, tpu.core_type = #tpu.core_type<tc>, window_params = [{transform_indices = @transform_0, window_bounds = array<i64: 1, 1, 16, 4>}, {transform_indices = @transform_1, window_bounds = array<i64: 1, 8, 16, 4>}, {transform_indices = @transform_2, window_bounds = array<i64: 1, 1, 16, 4>}, {pipeline_mode = #tpu.pipeline_mode<synchronous>, transform_indices = @transform_3, window_bounds = array<i64: 4, 8>}, {pipeline_mode = #tpu.pipeline_mode<synchronous>, transform_indices = @transform_4, window_bounds = array<i64: 1, 8>}, {pipeline_mode = #tpu.pipeline_mode<synchronous>, transform_indices = @transform_5, window_bounds = array<i64: 1, 8>}, {pipeline_mode = #tpu.pipeline_mode<synchronous>, transform_indices = @transform_6, window_bounds = array<i64: 9, 8, 8>}, {pipeline_mode = #tpu.pipeline_mode<synchronous>, transform_indices = @transform_7, window_bounds = array<i64: 1, 8>}, {pipeline_mode = #tpu.pipeline_mode<synchronous>, transform_indices = @transform_8, window_bounds = array<i64: 1, 8>}, {pipeline_mode = #tpu.pipeline_mode<synchronous>, transform_indices = @transform_9, window_bounds = array<i64: 8, 16>}, {pipeline_mode = #tpu.pipeline_mode<synchronous>, transform_indices = @transform_10, window_bounds = array<i64: 1, 16>}, {pipeline_mode = #tpu.pipeline_mode<synchronous>, transform_indices = @transform_11, window_bounds = array<i64: 1, 16>}, {pipeline_mode = #tpu.pipeline_mode<synchronous>, transform_indices = @transform_12, window_bounds = array<i64: 4, 16>}, {pipeline_mode = #tpu.pipeline_mode<synchronous>, transform_indices = @transform_13, window_bounds = array<i64: 1, 16>}, {pipeline_mode = #tpu.pipeline_mode<synchronous>, transform_indices = @transform_14, window_bounds = array<i64: 1, 16>}, {transform_indices = @transform_15, window_bounds = array<i64: 1, 8, 16, 16>}]} {
    %c0 = arith.constant 0 : index
    %c0_0 = arith.constant 0 : index
    %0 = vector.load %arg5[%c0, %c0_0] : memref<4x8xf32, #tpu.memory_space<vmem>>, vector<4x8xf32>
    %c0_1 = arith.constant 0 : index
    %c0_2 = arith.constant 0 : index
    %1 = vector.load %arg6[%c0_1, %c0_2] : memref<1x8xf32, #tpu.memory_space<vmem>>, vector<1x8xf32>
    %c0_3 = arith.constant 0 : index
    %c0_4 = arith.constant 0 : index
    %2 = vector.load %arg7[%c0_3, %c0_4] : memref<1x8xf32, #tpu.memory_space<vmem>>, vector<1x8xf32>
    %c0_5 = arith.constant 0 : index
    %c0_6 = arith.constant 0 : index
    %c0_7 = arith.constant 0 : index
    %c0_8 = arith.constant 0 : index
    %3 = vector.load %arg3[%c0_5, %c0_6, %c0_7, %c0_8] : memref<1x8x16x4xf32, #tpu.memory_space<vmem>>, vector<1x8x16x4xf32>
    %4 = vector.shape_cast %3 : vector<1x8x16x4xf32> to vector<8x16x4xf32>
    %5 = vector.shape_cast %4 : vector<8x16x4xf32> to vector<128x4xf32>
    %cst = arith.constant dense<0.000000e+00> : vector<128x8xf32>
    %6 = tpu.matmul %5, %0, %cst {dimension_numbers = #tpu.dot_dimension_numbers<[1], [0], [0], [1], [0, 0, 1, 1], [], []>} : vector<128x4xf32>, vector<4x8xf32>, vector<128x8xf32> -> vector<128x8xf32>
    %7 = vector.broadcast %1 : vector<1x8xf32> to vector<128x8xf32>
    %8 = arith.mulf %6, %7 : vector<128x8xf32>
    %9 = vector.broadcast %2 : vector<1x8xf32> to vector<128x8xf32>
    %10 = arith.addf %8, %9 : vector<128x8xf32>
    %cst_9 = arith.constant 0.000000e+00 : f32
    %11 = vector.broadcast %cst_9 : f32 to vector<128x8xf32>
    %12 = arith.maximumf %10, %11 : vector<128x8xf32>
    %c16 = arith.constant 16 : index
    %c0_10 = arith.constant 0 : index
    %13 = vector.load %arg18[%c16, %c0_10] : memref<160x8xf32, #tpu.memory_space<vmem>>, vector<128x8xf32>
    tpu.vector_store %arg18[%c16, %c0_10], %12 {strides = array<i32>} : memref<160x8xf32, #tpu.memory_space<vmem>>, vector<128x8xf32>,
    %cst_11 = arith.constant 0.000000e+00 : f32
    %14 = vector.broadcast %cst_11 : f32 to vector<16x8xf32>
    %c0_i32 = arith.constant 0 : i32
    %15 = arith.cmpi eq, %arg1, %c0_i32 : i32
    %16 = arith.extui %15 : i1 to i32
    %c0_i32_12 = arith.constant 0 : i32
    %17 = arith.cmpi ne, %16, %c0_i32_12 : i32
    scf.if %17 {
      %c0_96 = arith.constant 0 : index
      %c0_97 = arith.constant 0 : index
      %133 = vector.load %arg18[%c0_96, %c0_97] : memref<160x8xf32, #tpu.memory_space<vmem>>, vector<16x8xf32>
      tpu.vector_store %arg18[%c0_96, %c0_97], %14 {strides = array<i32>} : memref<160x8xf32, #tpu.memory_space<vmem>>, vector<16x8xf32>,
    } else {
    }
    %c0_i32_13 = arith.constant 0 : i32
    %18 = arith.cmpi sgt, %arg1, %c0_i32_13 : i32
    %19 = arith.extui %18 : i1 to i32
    %c0_i32_14 = arith.constant 0 : i32
    %20 = arith.cmpi ne, %19, %c0_i32_14 : i32
    scf.if %20 {
      %c0_96 = arith.constant 0 : index
      %c0_97 = arith.constant 0 : index
      %c0_98 = arith.constant 0 : index
      %c0_99 = arith.constant 0 : index
      %133 = vector.load %arg2[%c0_96, %c0_97, %c0_98, %c0_99] : memref<1x1x16x4xf32, #tpu.memory_space<vmem>>, vector<1x1x16x4xf32>
      %134 = vector.shape_cast %133 : vector<1x1x16x4xf32> to vector<1x16x4xf32>
      %135 = vector.shape_cast %134 : vector<1x16x4xf32> to vector<16x4xf32>
      %cst_100 = arith.constant dense<0.000000e+00> : vector<16x8xf32>
      %136 = tpu.matmul %135, %0, %cst_100 {dimension_numbers = #tpu.dot_dimension_numbers<[1], [0], [0], [1], [0, 0, 1, 1], [], []>} : vector<16x4xf32>, vector<4x8xf32>, vector<16x8xf32> -> vector<16x8xf32>
      %137 = vector.broadcast %1 : vector<1x8xf32> to vector<16x8xf32>
      %138 = arith.mulf %136, %137 : vector<16x8xf32>
      %139 = vector.broadcast %2 : vector<1x8xf32> to vector<16x8xf32>
      %140 = arith.addf %138, %139 : vector<16x8xf32>
      %cst_101 = arith.constant 0.000000e+00 : f32
      %141 = vector.broadcast %cst_101 : f32 to vector<16x8xf32>
      %142 = arith.maximumf %140, %141 : vector<16x8xf32>
      %c0_102 = arith.constant 0 : index
      %c0_103 = arith.constant 0 : index
      %143 = vector.load %arg18[%c0_102, %c0_103] : memref<160x8xf32, #tpu.memory_space<vmem>>, vector<16x8xf32>
      tpu.vector_store %arg18[%c0_102, %c0_103], %142 {strides = array<i32>} : memref<160x8xf32, #tpu.memory_space<vmem>>, vector<16x8xf32>,
    } else {
    }
    %c1_i32 = arith.constant 1 : i32
    %21 = arith.cmpi eq, %arg1, %c1_i32 : i32
    %22 = arith.extui %21 : i1 to i32
    %c0_i32_15 = arith.constant 0 : i32
    %23 = arith.cmpi ne, %22, %c0_i32_15 : i32
    scf.if %23 {
      %c144 = arith.constant 144 : index
      %c0_96 = arith.constant 0 : index
      %133 = vector.load %arg18[%c144, %c0_96] : memref<160x8xf32, #tpu.memory_space<vmem>>, vector<16x8xf32>
      tpu.vector_store %arg18[%c144, %c0_96], %14 {strides = array<i32>} : memref<160x8xf32, #tpu.memory_space<vmem>>, vector<16x8xf32>,
    } else {
    }
    %c1_i32_16 = arith.constant 1 : i32
    %24 = arith.cmpi slt, %arg1, %c1_i32_16 : i32
    %25 = arith.extui %24 : i1 to i32
    %c0_i32_17 = arith.constant 0 : i32
    %26 = arith.cmpi ne, %25, %c0_i32_17 : i32
    scf.if %26 {
      %c0_96 = arith.constant 0 : index
      %c0_97 = arith.constant 0 : index
      %c0_98 = arith.constant 0 : index
      %c0_99 = arith.constant 0 : index
      %133 = vector.load %arg4[%c0_96, %c0_97, %c0_98, %c0_99] : memref<1x1x16x4xf32, #tpu.memory_space<vmem>>, vector<1x1x16x4xf32>
      %134 = vector.shape_cast %133 : vector<1x1x16x4xf32> to vector<1x16x4xf32>
      %135 = vector.shape_cast %134 : vector<1x16x4xf32> to vector<16x4xf32>
      %cst_100 = arith.constant dense<0.000000e+00> : vector<16x8xf32>
      %136 = tpu.matmul %135, %0, %cst_100 {dimension_numbers = #tpu.dot_dimension_numbers<[1], [0], [0], [1], [0, 0, 1, 1], [], []>} : vector<16x4xf32>, vector<4x8xf32>, vector<16x8xf32> -> vector<16x8xf32>
      %137 = vector.broadcast %1 : vector<1x8xf32> to vector<16x8xf32>
      %138 = arith.mulf %136, %137 : vector<16x8xf32>
      %139 = vector.broadcast %2 : vector<1x8xf32> to vector<16x8xf32>
      %140 = arith.addf %138, %139 : vector<16x8xf32>
      %cst_101 = arith.constant 0.000000e+00 : f32
      %141 = vector.broadcast %cst_101 : f32 to vector<16x8xf32>
      %142 = arith.maximumf %140, %141 : vector<16x8xf32>
      %c144 = arith.constant 144 : index
      %c0_102 = arith.constant 0 : index
      %143 = vector.load %arg18[%c144, %c0_102] : memref<160x8xf32, #tpu.memory_space<vmem>>, vector<16x8xf32>
      tpu.vector_store %arg18[%c144, %c0_102], %142 {strides = array<i32>} : memref<160x8xf32, #tpu.memory_space<vmem>>, vector<16x8xf32>,
    } else {
    }
    %27 = tpu.iota {dimensions = array<i32: 0>} : vector<128x1xi32>
    %c16_i32 = arith.constant 16 : i32
    %c0_i32_18 = arith.constant 0 : i32
    %28 = arith.cmpi eq, %c16_i32, %c0_i32_18 : i32
    %c1_i32_19 = arith.constant 1 : i32
    %29 = arith.select %28, %c1_i32_19, %c16_i32 : i32
    %30 = vector.broadcast %29 : i32 to vector<128x1xi32>
    %31 = arith.remsi %27, %30 : vector<128x1xi32>
    %c0_i32_20 = arith.constant 0 : i32
    %32 = vector.broadcast %c0_i32_20 : i32 to vector<128x1xi32>
    %33 = arith.cmpi ne, %31, %32 : vector<128x1xi32>
    %c0_i32_21 = arith.constant 0 : i32
    %34 = vector.broadcast %c0_i32_21 : i32 to vector<128x1xi32>
    %35 = arith.cmpi slt, %31, %34 : vector<128x1xi32>
    %c0_i32_22 = arith.constant 0 : i32
    %36 = arith.cmpi slt, %29, %c0_i32_22 : i32
    %37 = vector.broadcast %36 : i1 to vector<128x1xi1>
    %38 = vector.broadcast %37 : vector<128x1xi1> to vector<128x1xi1>
    %39 = arith.xori %35, %38 : vector<128x1xi1>
    %40 = arith.andi %39, %33 : vector<128x1xi1>
    %41 = vector.broadcast %29 : i32 to vector<128x1xi32>
    %42 = arith.addi %31, %41 : vector<128x1xi32>
    %43 = arith.select %40, %42, %31 : vector<128x1xi1>, vector<128x1xi32>
    %c0_23 = arith.constant 0 : index
    %c0_24 = arith.constant 0 : index
    %44 = vector.load %arg18[%c0_23, %c0_24] : memref<160x8xf32, #tpu.memory_space<vmem>>, vector<128x8xf32>
    %c1 = arith.constant 1 : index
    %c0_25 = arith.constant 0 : index
    %c0_26 = arith.constant 0 : index
    %45 = vector.load %arg8[%c1, %c0_25, %c0_26] : memref<9x8x8xf32, #tpu.memory_space<vmem>>, vector<1x8x8xf32>
    %46 = vector.shape_cast %45 : vector<1x8x8xf32> to vector<8x8xf32>
    %cst_27 = arith.constant dense<0.000000e+00> : vector<128x8xf32>
    %47 = tpu.matmul %44, %46, %cst_27 {dimension_numbers = #tpu.dot_dimension_numbers<[1], [0], [0], [1], [0, 0, 1, 1], [], []>} : vector<128x8xf32>, vector<8x8xf32>, vector<128x8xf32> -> vector<128x8xf32>
    %c16_28 = arith.constant 16 : index
    %c0_29 = arith.constant 0 : index
    %48 = vector.load %arg18[%c16_28, %c0_29] : memref<160x8xf32, #tpu.memory_space<vmem>>, vector<128x8xf32>
    %c4 = arith.constant 4 : index
    %c0_30 = arith.constant 0 : index
    %c0_31 = arith.constant 0 : index
    %49 = vector.load %arg8[%c4, %c0_30, %c0_31] : memref<9x8x8xf32, #tpu.memory_space<vmem>>, vector<1x8x8xf32>
    %50 = vector.shape_cast %49 : vector<1x8x8xf32> to vector<8x8xf32>
    %cst_32 = arith.constant dense<0.000000e+00> : vector<128x8xf32>
    %51 = tpu.matmul %48, %50, %cst_32 {dimension_numbers = #tpu.dot_dimension_numbers<[1], [0], [0], [1], [0, 0, 1, 1], [], []>} : vector<128x8xf32>, vector<8x8xf32>, vector<128x8xf32> -> vector<128x8xf32>
    %52 = arith.addf %47, %51 : vector<128x8xf32>
    %c32 = arith.constant 32 : index
    %c0_33 = arith.constant 0 : index
    %53 = vector.load %arg18[%c32, %c0_33] : memref<160x8xf32, #tpu.memory_space<vmem>>, vector<128x8xf32>
    %c7 = arith.constant 7 : index
    %c0_34 = arith.constant 0 : index
    %c0_35 = arith.constant 0 : index
    %54 = vector.load %arg8[%c7, %c0_34, %c0_35] : memref<9x8x8xf32, #tpu.memory_space<vmem>>, vector<1x8x8xf32>
    %55 = vector.shape_cast %54 : vector<1x8x8xf32> to vector<8x8xf32>
    %cst_36 = arith.constant dense<0.000000e+00> : vector<128x8xf32>
    %56 = tpu.matmul %53, %55, %cst_36 {dimension_numbers = #tpu.dot_dimension_numbers<[1], [0], [0], [1], [0, 0, 1, 1], [], []>} : vector<128x8xf32>, vector<8x8xf32>, vector<128x8xf32> -> vector<128x8xf32>
    %57 = arith.addf %52, %56 : vector<128x8xf32>
    %c0_i32_37 = arith.constant 0 : i32
    %58 = vector.broadcast %c0_i32_37 : i32 to vector<128x1xi32>
    %59 = arith.cmpi sgt, %43, %58 : vector<128x1xi32>
    %c0_38 = arith.constant 0 : index
    %c0_39 = arith.constant 0 : index
    %60 = vector.load %arg18[%c0_38, %c0_39] : memref<160x8xf32, #tpu.memory_space<vmem>>, vector<128x8xf32>
    %c0_40 = arith.constant 0 : index
    %c0_41 = arith.constant 0 : index
    %c0_42 = arith.constant 0 : index
    %61 = vector.load %arg8[%c0_40, %c0_41, %c0_42] : memref<9x8x8xf32, #tpu.memory_space<vmem>>, vector<1x8x8xf32>
    %62 = vector.shape_cast %61 : vector<1x8x8xf32> to vector<8x8xf32>
    %cst_43 = arith.constant dense<0.000000e+00> : vector<128x8xf32>
    %63 = tpu.matmul %60, %62, %cst_43 {dimension_numbers = #tpu.dot_dimension_numbers<[1], [0], [0], [1], [0, 0, 1, 1], [], []>} : vector<128x8xf32>, vector<8x8xf32>, vector<128x8xf32> -> vector<128x8xf32>
    %c16_44 = arith.constant 16 : index
    %c0_45 = arith.constant 0 : index
    %64 = vector.load %arg18[%c16_44, %c0_45] : memref<160x8xf32, #tpu.memory_space<vmem>>, vector<128x8xf32>
    %c3 = arith.constant 3 : index
    %c0_46 = arith.constant 0 : index
    %c0_47 = arith.constant 0 : index
    %65 = vector.load %arg8[%c3, %c0_46, %c0_47] : memref<9x8x8xf32, #tpu.memory_space<vmem>>, vector<1x8x8xf32>
    %66 = vector.shape_cast %65 : vector<1x8x8xf32> to vector<8x8xf32>
    %cst_48 = arith.constant dense<0.000000e+00> : vector<128x8xf32>
    %67 = tpu.matmul %64, %66, %cst_48 {dimension_numbers = #tpu.dot_dimension_numbers<[1], [0], [0], [1], [0, 0, 1, 1], [], []>} : vector<128x8xf32>, vector<8x8xf32>, vector<128x8xf32> -> vector<128x8xf32>
    %68 = arith.addf %63, %67 : vector<128x8xf32>
    %c32_49 = arith.constant 32 : index
    %c0_50 = arith.constant 0 : index
    %69 = vector.load %arg18[%c32_49, %c0_50] : memref<160x8xf32, #tpu.memory_space<vmem>>, vector<128x8xf32>
    %c6 = arith.constant 6 : index
    %c0_51 = arith.constant 0 : index
    %c0_52 = arith.constant 0 : index
    %70 = vector.load %arg8[%c6, %c0_51, %c0_52] : memref<9x8x8xf32, #tpu.memory_space<vmem>>, vector<1x8x8xf32>
    %71 = vector.shape_cast %70 : vector<1x8x8xf32> to vector<8x8xf32>
    %cst_53 = arith.constant dense<0.000000e+00> : vector<128x8xf32>
    %72 = tpu.matmul %69, %71, %cst_53 {dimension_numbers = #tpu.dot_dimension_numbers<[1], [0], [0], [1], [0, 0, 1, 1], [], []>} : vector<128x8xf32>, vector<8x8xf32>, vector<128x8xf32> -> vector<128x8xf32>
    %73 = arith.addf %68, %72 : vector<128x8xf32>
    %c1_i32_54 = arith.constant 1 : i32
    %74 = tpu.dynamic_rotate %73 by %c1_i32_54 dim 0 : vector<128x8xf32>, i32 -> vector<128x8xf32>
    %cst_55 = arith.constant 0.000000e+00 : f32
    %75 = vector.shape_cast %59 : vector<128x1xi1> to vector<128x1xi1>
    %76 = vector.broadcast %75 : vector<128x1xi1> to vector<128x8xi1>
    %77 = vector.broadcast %cst_55 : f32 to vector<128x8xf32>
    %78 = arith.select %76, %74, %77 : vector<128x8xi1>, vector<128x8xf32>
    %79 = arith.addf %57, %78 : vector<128x8xf32>
    %c15_i32 = arith.constant 15 : i32
    %80 = vector.broadcast %c15_i32 : i32 to vector<128x1xi32>
    %81 = arith.cmpi slt, %43, %80 : vector<128x1xi32>
    %c0_56 = arith.constant 0 : index
    %c0_57 = arith.constant 0 : index
    %82 = vector.load %arg18[%c0_56, %c0_57] : memref<160x8xf32, #tpu.memory_space<vmem>>, vector<128x8xf32>
    %c2 = arith.constant 2 : index
    %c0_58 = arith.constant 0 : index
    %c0_59 = arith.constant 0 : index
    %83 = vector.load %arg8[%c2, %c0_58, %c0_59] : memref<9x8x8xf32, #tpu.memory_space<vmem>>, vector<1x8x8xf32>
    %84 = vector.shape_cast %83 : vector<1x8x8xf32> to vector<8x8xf32>
    %cst_60 = arith.constant dense<0.000000e+00> : vector<128x8xf32>
    %85 = tpu.matmul %82, %84, %cst_60 {dimension_numbers = #tpu.dot_dimension_numbers<[1], [0], [0], [1], [0, 0, 1, 1], [], []>} : vector<128x8xf32>, vector<8x8xf32>, vector<128x8xf32> -> vector<128x8xf32>
    %c16_61 = arith.constant 16 : index
    %c0_62 = arith.constant 0 : index
    %86 = vector.load %arg18[%c16_61, %c0_62] : memref<160x8xf32, #tpu.memory_space<vmem>>, vector<128x8xf32>
    %c5 = arith.constant 5 : index
    %c0_63 = arith.constant 0 : index
    %c0_64 = arith.constant 0 : index
    %87 = vector.load %arg8[%c5, %c0_63, %c0_64] : memref<9x8x8xf32, #tpu.memory_space<vmem>>, vector<1x8x8xf32>
    %88 = vector.shape_cast %87 : vector<1x8x8xf32> to vector<8x8xf32>
    %cst_65 = arith.constant dense<0.000000e+00> : vector<128x8xf32>
    %89 = tpu.matmul %86, %88, %cst_65 {dimension_numbers = #tpu.dot_dimension_numbers<[1], [0], [0], [1], [0, 0, 1, 1], [], []>} : vector<128x8xf32>, vector<8x8xf32>, vector<128x8xf32> -> vector<128x8xf32>
    %90 = arith.addf %85, %89 : vector<128x8xf32>
    %c32_66 = arith.constant 32 : index
    %c0_67 = arith.constant 0 : index
    %91 = vector.load %arg18[%c32_66, %c0_67] : memref<160x8xf32, #tpu.memory_space<vmem>>, vector<128x8xf32>
    %c8 = arith.constant 8 : index
    %c0_68 = arith.constant 0 : index
    %c0_69 = arith.constant 0 : index
    %92 = vector.load %arg8[%c8, %c0_68, %c0_69] : memref<9x8x8xf32, #tpu.memory_space<vmem>>, vector<1x8x8xf32>
    %93 = vector.shape_cast %92 : vector<1x8x8xf32> to vector<8x8xf32>
    %cst_70 = arith.constant dense<0.000000e+00> : vector<128x8xf32>
    %94 = tpu.matmul %91, %93, %cst_70 {dimension_numbers = #tpu.dot_dimension_numbers<[1], [0], [0], [1], [0, 0, 1, 1], [], []>} : vector<128x8xf32>, vector<8x8xf32>, vector<128x8xf32> -> vector<128x8xf32>
    %95 = arith.addf %90, %94 : vector<128x8xf32>
    %c127_i32 = arith.constant 127 : i32
    %96 = tpu.dynamic_rotate %95 by %c127_i32 dim 0 : vector<128x8xf32>, i32 -> vector<128x8xf32>
    %cst_71 = arith.constant 0.000000e+00 : f32
    %97 = vector.shape_cast %81 : vector<128x1xi1> to vector<128x1xi1>
    %98 = vector.broadcast %97 : vector<128x1xi1> to vector<128x8xi1>
    %99 = vector.broadcast %cst_71 : f32 to vector<128x8xf32>
    %100 = arith.select %98, %96, %99 : vector<128x8xi1>, vector<128x8xf32>
    %101 = arith.addf %79, %100 : vector<128x8xf32>
    %c0_72 = arith.constant 0 : index
    %c0_73 = arith.constant 0 : index
    %102 = vector.load %arg9[%c0_72, %c0_73] : memref<1x8xf32, #tpu.memory_space<vmem>>, vector<1x8xf32>
    %103 = vector.broadcast %102 : vector<1x8xf32> to vector<128x8xf32>
    %104 = arith.mulf %101, %103 : vector<128x8xf32>
    %c0_74 = arith.constant 0 : index
    %c0_75 = arith.constant 0 : index
    %105 = vector.load %arg10[%c0_74, %c0_75] : memref<1x8xf32, #tpu.memory_space<vmem>>, vector<1x8xf32>
    %106 = vector.broadcast %105 : vector<1x8xf32> to vector<128x8xf32>
    %107 = arith.addf %104, %106 : vector<128x8xf32>
    %cst_76 = arith.constant 0.000000e+00 : f32
    %108 = vector.broadcast %cst_76 : f32 to vector<128x8xf32>
    %109 = arith.maximumf %107, %108 : vector<128x8xf32>
    %c0_77 = arith.constant 0 : index
    %c0_78 = arith.constant 0 : index
    %110 = vector.load %arg11[%c0_77, %c0_78] : memref<8x16xf32, #tpu.memory_space<vmem>>, vector<8x16xf32>
    %cst_79 = arith.constant dense<0.000000e+00> : vector<128x16xf32>
    %111 = tpu.matmul %109, %110, %cst_79 {dimension_numbers = #tpu.dot_dimension_numbers<[1], [0], [0], [1], [0, 0, 1, 1], [], []>} : vector<128x8xf32>, vector<8x16xf32>, vector<128x16xf32> -> vector<128x16xf32>
    %c0_80 = arith.constant 0 : index
    %c0_81 = arith.constant 0 : index
    %112 = vector.load %arg12[%c0_80, %c0_81] : memref<1x16xf32, #tpu.memory_space<vmem>>, vector<1x16xf32>
    %113 = vector.broadcast %112 : vector<1x16xf32> to vector<128x16xf32>
    %114 = arith.mulf %111, %113 : vector<128x16xf32>
    %c0_82 = arith.constant 0 : index
    %c0_83 = arith.constant 0 : index
    %115 = vector.load %arg13[%c0_82, %c0_83] : memref<1x16xf32, #tpu.memory_space<vmem>>, vector<1x16xf32>
    %116 = vector.broadcast %115 : vector<1x16xf32> to vector<128x16xf32>
    %117 = arith.addf %114, %116 : vector<128x16xf32>
    %c0_84 = arith.constant 0 : index
    %c0_85 = arith.constant 0 : index
    %118 = vector.load %arg14[%c0_84, %c0_85] : memref<4x16xf32, #tpu.memory_space<vmem>>, vector<4x16xf32>
    %cst_86 = arith.constant dense<0.000000e+00> : vector<128x16xf32>
    %119 = tpu.matmul %5, %118, %cst_86 {dimension_numbers = #tpu.dot_dimension_numbers<[1], [0], [0], [1], [0, 0, 1, 1], [], []>} : vector<128x4xf32>, vector<4x16xf32>, vector<128x16xf32> -> vector<128x16xf32>
    %c0_87 = arith.constant 0 : index
    %c0_88 = arith.constant 0 : index
    %120 = vector.load %arg15[%c0_87, %c0_88] : memref<1x16xf32, #tpu.memory_space<vmem>>, vector<1x16xf32>
    %121 = vector.broadcast %120 : vector<1x16xf32> to vector<128x16xf32>
    %122 = arith.mulf %119, %121 : vector<128x16xf32>
    %c0_89 = arith.constant 0 : index
    %c0_90 = arith.constant 0 : index
    %123 = vector.load %arg16[%c0_89, %c0_90] : memref<1x16xf32, #tpu.memory_space<vmem>>, vector<1x16xf32>
    %124 = vector.broadcast %123 : vector<1x16xf32> to vector<128x16xf32>
    %125 = arith.addf %122, %124 : vector<128x16xf32>
    %126 = arith.addf %117, %125 : vector<128x16xf32>
    %cst_91 = arith.constant 0.000000e+00 : f32
    %127 = vector.broadcast %cst_91 : f32 to vector<128x16xf32>
    %128 = arith.maximumf %126, %127 : vector<128x16xf32>
    %129 = vector.shape_cast %128 : vector<128x16xf32> to vector<8x16x16xf32>
    %c0_92 = arith.constant 0 : index
    %c0_93 = arith.constant 0 : index
    %c0_94 = arith.constant 0 : index
    %c0_95 = arith.constant 0 : index
    %130 = vector.load %arg17[%c0_92, %c0_93, %c0_94, %c0_95] : memref<1x8x16x16xf32, #tpu.memory_space<vmem>>, vector<1x8x16x16xf32>
    %131 = vector.shape_cast %130 : vector<1x8x16x16xf32> to vector<8x16x16xf32>
    %132 = vector.shape_cast %129 : vector<8x16x16xf32> to vector<1x8x16x16xf32>
    tpu.vector_store %arg17[%c0_92, %c0_93, %c0_94, %c0_95], %132 {strides = array<i32>} : memref<1x8x16x16xf32, #tpu.memory_space<vmem>>, vector<1x8x16x16xf32>,
    return
  }
  func.func @transform_0(%arg0: i32, %arg1: i32) -> (i32, i32, i32, i32) {
    %c8_i32 = arith.constant 8 : i32
    %0 = arith.muli %arg1, %c8_i32 : i32
    %c1_i32 = arith.constant 1 : i32
    %1 = arith.subi %0, %c1_i32 : i32
    %c0_i32 = arith.constant 0 : i32
    %2 = arith.maxsi %1, %c0_i32 : i32
    %c0_i32_0 = arith.constant 0 : i32
    %c0_i32_1 = arith.constant 0 : i32
    %c0_i32_2 = arith.constant 0 : i32
    return %arg0, %2, %c0_i32_0, %c0_i32_1 : i32, i32, i32, i32
  }
  func.func @transform_1(%arg0: i32, %arg1: i32) -> (i32, i32, i32, i32) {
    %c0_i32 = arith.constant 0 : i32
    %c0_i32_0 = arith.constant 0 : i32
    %c0_i32_1 = arith.constant 0 : i32
    return %arg0, %arg1, %c0_i32, %c0_i32_0 : i32, i32, i32, i32
  }
  func.func @transform_2(%arg0: i32, %arg1: i32) -> (i32, i32, i32, i32) {
    %c8_i32 = arith.constant 8 : i32
    %0 = arith.muli %arg1, %c8_i32 : i32
    %c8_i32_0 = arith.constant 8 : i32
    %1 = arith.addi %0, %c8_i32_0 : i32
    %c15_i32 = arith.constant 15 : i32
    %2 = arith.minsi %1, %c15_i32 : i32
    %c0_i32 = arith.constant 0 : i32
    %c0_i32_1 = arith.constant 0 : i32
    %c0_i32_2 = arith.constant 0 : i32
    return %arg0, %2, %c0_i32, %c0_i32_1 : i32, i32, i32, i32
  }
  func.func @transform_3(%arg0: i32, %arg1: i32) -> (i32, i32) {
    %c0_i32 = arith.constant 0 : i32
    %c0_i32_0 = arith.constant 0 : i32
    %c0_i32_1 = arith.constant 0 : i32
    return %c0_i32, %c0_i32_0 : i32, i32
  }
  func.func @transform_4(%arg0: i32, %arg1: i32) -> (i32, i32) {
    %c0_i32 = arith.constant 0 : i32
    %c0_i32_0 = arith.constant 0 : i32
    %c0_i32_1 = arith.constant 0 : i32
    return %c0_i32, %c0_i32_0 : i32, i32
  }
  func.func @transform_5(%arg0: i32, %arg1: i32) -> (i32, i32) {
    %c0_i32 = arith.constant 0 : i32
    %c0_i32_0 = arith.constant 0 : i32
    %c0_i32_1 = arith.constant 0 : i32
    return %c0_i32, %c0_i32_0 : i32, i32
  }
  func.func @transform_6(%arg0: i32, %arg1: i32) -> (i32, i32, i32) {
    %c0_i32 = arith.constant 0 : i32
    %c0_i32_0 = arith.constant 0 : i32
    %c0_i32_1 = arith.constant 0 : i32
    %c0_i32_2 = arith.constant 0 : i32
    return %c0_i32, %c0_i32_0, %c0_i32_1 : i32, i32, i32
  }
  func.func @transform_7(%arg0: i32, %arg1: i32) -> (i32, i32) {
    %c0_i32 = arith.constant 0 : i32
    %c0_i32_0 = arith.constant 0 : i32
    %c0_i32_1 = arith.constant 0 : i32
    return %c0_i32, %c0_i32_0 : i32, i32
  }
  func.func @transform_8(%arg0: i32, %arg1: i32) -> (i32, i32) {
    %c0_i32 = arith.constant 0 : i32
    %c0_i32_0 = arith.constant 0 : i32
    %c0_i32_1 = arith.constant 0 : i32
    return %c0_i32, %c0_i32_0 : i32, i32
  }
  func.func @transform_9(%arg0: i32, %arg1: i32) -> (i32, i32) {
    %c0_i32 = arith.constant 0 : i32
    %c0_i32_0 = arith.constant 0 : i32
    %c0_i32_1 = arith.constant 0 : i32
    return %c0_i32, %c0_i32_0 : i32, i32
  }
  func.func @transform_10(%arg0: i32, %arg1: i32) -> (i32, i32) {
    %c0_i32 = arith.constant 0 : i32
    %c0_i32_0 = arith.constant 0 : i32
    %c0_i32_1 = arith.constant 0 : i32
    return %c0_i32, %c0_i32_0 : i32, i32
  }
  func.func @transform_11(%arg0: i32, %arg1: i32) -> (i32, i32) {
    %c0_i32 = arith.constant 0 : i32
    %c0_i32_0 = arith.constant 0 : i32
    %c0_i32_1 = arith.constant 0 : i32
    return %c0_i32, %c0_i32_0 : i32, i32
  }
  func.func @transform_12(%arg0: i32, %arg1: i32) -> (i32, i32) {
    %c0_i32 = arith.constant 0 : i32
    %c0_i32_0 = arith.constant 0 : i32
    %c0_i32_1 = arith.constant 0 : i32
    return %c0_i32, %c0_i32_0 : i32, i32
  }
  func.func @transform_13(%arg0: i32, %arg1: i32) -> (i32, i32) {
    %c0_i32 = arith.constant 0 : i32
    %c0_i32_0 = arith.constant 0 : i32
    %c0_i32_1 = arith.constant 0 : i32
    return %c0_i32, %c0_i32_0 : i32, i32
  }
  func.func @transform_14(%arg0: i32, %arg1: i32) -> (i32, i32) {
    %c0_i32 = arith.constant 0 : i32
    %c0_i32_0 = arith.constant 0 : i32
    %c0_i32_1 = arith.constant 0 : i32
    return %c0_i32, %c0_i32_0 : i32, i32
  }
  func.func @transform_15(%arg0: i32, %arg1: i32) -> (i32, i32, i32, i32) {
    %c0_i32 = arith.constant 0 : i32
    %c0_i32_0 = arith.constant 0 : i32
    %c0_i32_1 = arith.constant 0 : i32
    return %arg0, %arg1, %c0_i32, %c0_i32_0 : i32, i32, i32, i32
  }
}

</mosaic_0001>

<bundles_post_ra>
// kernel: tpu_custom_call.1
= control target key start
LH: loop header
LB: loop body
LE: loop exit
PB: predicated region body
PF: predicated region fallthrough
CT: control target
= control target key end

     0   :  { %s4387_s0 = inlined_call_operand.vmem [shape: f32[2,16,16,4], index: 0, kind: input, shape index: {}]   ;;  %s4388_s1 = inlined_call_operand.vmem [shape: f32[2,16,16,4], index: 1, kind: input, shape index: {}]   ;;  %s4389_s2 = inlined_call_operand.vmem [shape: f32[2,16,16,4], index: 2, kind: input, shape index: {}]   ;;  %s4390_s3 = inlined_call_operand.vmem [shape: f32[4,8], index: 3, kind: input, shape index: {}]   ;;  %s4391_s4 = inlined_call_operand.vmem [shape: f32[1,8], index: 4, kind: input, shape index: {}]   ;;  %s4392_s5 = inlined_call_operand.vmem [shape: f32[1,8], index: 5, kind: input, shape index: {}]   ;;  %s4393_s6 = inlined_call_operand.vmem [shape: f32[9,8,8], index: 6, kind: input, shape index: {}]   ;;  %s4394_s7 = inlined_call_operand.vmem [shape: f32[1,8], index: 7, kind: input, shape index: {}]   ;;  %s4395_s8 = inlined_call_operand.vmem [shape: f32[1,8], index: 8, kind: input, shape index: {}]   ;;  %s4396_s9 = inlined_call_operand.vmem [shape: f32[8,16], index: 9, kind: input, shape index: {}]   ;;  %s4397_s10 = inlined_call_operand.vmem [shape: f32[1,16], index: 10, kind: input, shape index: {}]   ;;  %s4398_s11 = inlined_call_operand.vmem [shape: f32[1,16], index: 11, kind: input, shape index: {}]   ;;  %s4399_s12 = inlined_call_operand.vmem [shape: f32[4,16], index: 12, kind: input, shape index: {}]   ;;  %s4400_s13 = inlined_call_operand.vmem [shape: f32[1,16], index: 13, kind: input, shape index: {}]   ;;  %s4401_s14 = inlined_call_operand.vmem [shape: f32[1,16], index: 14, kind: input, shape index: {}]   ;;  %s4402_s15 = inlined_call_operand.hbm [shape: f32[2,16,16,16], index: 15, kind: output, shape index: {}]  }
   0x1   :  { %4426 = sst [smem:[#allocation35_spill]] %s4390_s3 }
   0x2   :  { %4427 = sst [smem:[#allocation36_spill]] %s4398_s11 }
   0x3   :  { %4428 = sst [smem:[#allocation37_spill]] %s4402_s15 }
   0x4   :  { %20 = vsyncpa [#allocation4], 0 }
   0x5   :  { %22 = vsyncpa [#allocation4 + $0x1], 0  ;;  %s3218_s18 = smov 0   ;;  %s3220_s19 = smov 0  }
   0x6   :  { %s3222_s20 = smov 0   ;;  %s3224_s21 = smov 0  }
   0x7   :  { %s3226_s22 = smov 0   ;;  %s3228_s23 = smov 0  }
   0x8   :  { %s3230_s24 = smov 0   ;;  %s3232_s25 = smov 0  }
   0x9 LB: > { %4429 = sst [smem:[#allocation6_spill]] %s3104_s18  ;;  %s2692_s26 = sadd.s32 4294967295, %s3132_s25   ;;  %s3132_s25 = sphi %s3232_s25, %s28_s25   ;;  %s3128_s24 = sphi %s3230_s24, %s4494_s24   ;;  %s3124_s23 = sphi %s3228_s23, %s4493_s23   ;;  %s3120_s22 = sphi %s3226_s22, %s4492_s22   ;;  %s3116_s21 = sphi %s3224_s21, %s4491_s21   ;;  %s3112_s20 = sphi %s3222_s20, %s4490_s20   ;;  %s3108_s19 = sphi %s3220_s19, %s4496_s19   ;;  %s3104_s18 = sphi %s3218_s18, %s4495_s18  }
   0xa   : > { %4430 = sst [smem:[#allocation7_spill]] %s3112_s20  ;;  %s2693_s27 = sadd.s32 4294967294, %s3132_s25  }
   0xb   : > { %4431 = sst [smem:[#allocation8_spill]] %s3120_s22  ;;  %s37_s28 = sadd.s32 1, %s3124_s23 }
   0xc   : > { %4432 = sst [smem:[#allocation9_spill]] %s3124_s23  ;;  %p38_p0 = scmp.ge.s32.totalorder %s37_s28, 2 }
   0xd   : > { %4433 = sst [smem:[#allocation10_spill]] %s3128_s24  ;;  %s40_s29 = sadd.s32 1, %s3128_s24 }
   0xe   : > { %4434 = sst [smem:[#allocation11_spill]] %s3132_s25  ;;  %p411_p1 = scmp.ne.s32.totalorder %s3112_s20, %s3108_s19 }
   0xf   : > { %p412_p2 = scmp.eq.s32.totalorder %s2692_s26, 3  ;;  %s4498_s28 = smov (%p38_p0, %s37_s28), 0 }
  0x10   : > { %4435 = sst [smem:[#allocation12_spill]] %s4498_s28  ;;  %s4500_s29 = smov (!%p38_p0, %s40_s29), %s3128_s24 }
  0x11   : > { %s397_s30 = ssub.s32 %s3124_s23, %s4498_s28  ;;  %p3269_p3 = por %p412_p2, %p411_p1 }
  0x12   : > { %p42_p4 = scmp.ge.s32.totalorder %s4500_s29, 2  ;;  %p417_p5 = scmp.ne.s32.totalorder %s3108_s19, %s3104_s18 }
  0x13   : > { %s4436_s16 = scalar_select %p3269_p3, 1, 0 }
  0x14   : > { %p418_p6 = scmp.eq.s32.totalorder %s2693_s27, 3  ;;  %p2702_p7 = scmp.ge.s32.totalorder %s3132_s25, 1 }
  0x15   : > { %4437 = sst [smem:[#allocation13_spill]] %s4436_s16  ;;  %s4502_s29 = smov (%p42_p4, %s4500_s29), 0 }
  0x16   : > { %4438 = sst [smem:[#allocation14_spill]] %s4502_s29  ;;  %p3278_p8 = por %p418_p6, %p417_p5 }
  0x17   : > { %p526_p9 = scmp.lt.s32.totalorder %s3132_s25, 5  ;;  %s396_s26 = ssub.s32 %s3128_s24, %s4502_s29 }
  0x18   : > { %s4439_s17 = scalar_select %p3278_p8, 1, 0 }
  0x19   : > { %s401_s15 = sadd.s32 1, %s3112_s20  ;;  %s398_s11 = sor.u32 %s397_s30, %s396_s26 }
  0x1a   : > { %4440 = sst [smem:[#allocation15_spill]] %s4439_s17  ;;  %p527_p10 = pnand %p2702_p7, %p526_p9 }
  0x1b   : > { %p399_p11 = scmp.eq.s32.totalorder %s398_s11, 0 }
  0x1c   : > { %530 = sbr.rel (%p527_p10) target bundleno = 1147 (0x47b), region = 80 }
  0x1d   : > { %s3287_s28 = scalar_select %p399_p11, %s3112_s20, %s401_s15  }
  0x1f   : > { %4441 = sst [smem:[#allocation16_spill]] %s3287_s28 }
  0x21   : > { %s4442_s3 = sld [smem:[#allocation35_spill]]  ;;  %vm719_vm0 = vcmask 1043456   ;;  %s2704_s27 = sshll.u32 %s3116_s21, 3  ;;  %vm670_vm1 = vcmask 31744   ;;  %v3416_v17 = vld [vmem:[%s4391_s4] ss:$0 sm:$0xff] }
  0x22   : > { %p609_p12 = scmp.lt.s32.totalorder %s3120_s22, 1  ;;  %s2705_s11 = sadd.s32 4294967295, %s2704_s27  ;;  %v3421_v18 = vld [vmem:[%s4392_s5] ss:$0 sm:$0xff]  ;;  %vm842_vm2 = vcmask 64512  }
  0x23   : > { %p625_p13 = scmp.lt.s32.totalorder %s2704_s27, 15  ;;  %p607_p0 = scmp.gt.s32.totalorder %s2705_s11, 0 }
  0x24   : > { %p2706_p1 = scmp.lt.s32.totalorder %s2705_s11, 15  ;;  %s634_s23 = sadd.s32 8, %s2704_s27 }
  0x25   : > { %s610_s15 = scalar_select %p609_p12, %s3120_s22, 1 }
  0x26   : > { %s4504_s11 = smov (!%p607_p0, %s2705_s11), 0  ;;  %s4508_s27 = smov (!%p625_p13, %s2704_s27), 15 }
  0x27   : > { %v3292_v0 = vld [vmem:[%s4442_s3] sm:$0xf]  ;;  %s2712_s18 = sshll.u32 %s610_s15, 5  ;;  %s4506_s11 = smov (!%p2706_p1, %s4504_s11), 15 }
  0x28   : > { %2948 = vmatpush.msk.msra.mxu2 %vm719_vm0, %v3292_v0  ;;  %2949 = vmatpush.msk.msra.mxu3 %vm719_vm0, %v3292_v0  ;;  %s2711_s30 = sshll.u32 %s4506_s11, 1  ;;  %p3305_p2 = scmp.lt.s32.totalorder %s634_s23, 15 }
  0x29   : > { %2725 = vmatpush.msk.msra.mxu0 %vm719_vm0, %v3292_v0  ;;  %2947 = vmatpush.msk.msra.mxu1 %vm719_vm0, %v3292_v0  ;;  %s615_s3 = sadd.s32 %s2712_s18, %s2711_s30  ;;  %s2715_s29 = sshll.u32 %s4508_s27, 1 }
  0x2a   : > { %s2713_s24 = sshll.u32 %s615_s3, 3  ;;  %s629_s28 = sadd.s32 %s2715_s29, %s2712_s18 }
  0x2b   : > { %s3312_s25 = scalar_lea.vmem %s4387_s0, %s2713_s24  ;;  %s2717_s15 = sshll.u32 %s629_s28, 3 }
  0x2c   : > { %s3317_s22 = scalar_lea.vmem %s4388_s1, %s2717_s15  ;;  %s602_s27 = sand.u32 1, %s3108_s19  }
  0x2d   : > { %s4510_s23 = smov (!%p3305_p2, %s634_s23), 15  ;;  %v3323_v1 = vld [vmem:[%s3317_s22 + $0x40] sm:$0xff]  ;;  %s3337_s3 = sshll.u32 %s602_s27, 7  ;;  %v3349_v5 = vld [vmem:[%s3317_s22 + $0x48] sm:$0xff]  ;;  %v3374_v9 = vld [vmem:[%s3317_s22 + $0x50] sm:$0xff] }
  0x2e   : > { %v3326_v2 = vld [vmem:[%s3317_s22 + $0x60] sm:$0xff]  ;;  %2734 = vmatmul.msk.f32.vlgmr.msra.gmra.mxu2 %vm670_vm1, %v3323_v1  ;;  %s4512_s23 = smov (!%p3305_p2, %s4510_s23), 15  ;;  %4445 = vst [vmem:[#allocation18_spill] sm:$0xff] %v3349_v5  ;;  %v3352_v6 = vld [vmem:[%s3317_s22 + $0x68] sm:$0xff]  ;;  %v3377_v10 = vld [vmem:[%s3317_s22 + $0x70] sm:$0xff]  ;;  %s3472_s26 = scalar_lea.vmem [#allocation3], %s3337_s3 }
  0x2f   : > { %4444 = vst [vmem:[#allocation17_spill] sm:$0xff] %v3326_v2  ;;  %v3329_v3 = vld [vmem:[%s3317_s22] sm:$0xff]  ;;  %2738 = vmatmul.msk.f32.vlgmr.msra.gmra.mxu3 %vm670_vm1, %v3326_v2  ;;  %s2722_s20 = sshll.u32 %s4512_s23, 1  ;;  %v3360_v7 = vld [vmem:[%s3317_s22 + $0x8] sm:$0xff]  ;;  %v3380_v11 = vld [vmem:[%s3317_s22 + $0x10] sm:$0xff]  ;;  %p2742_p4 = scmp.ne.s32.totalorder %s3116_s21, 0 }
  0x30   : > { %v3340_v4 = vld [vmem:[%s3317_s22 + $0x20] sm:$0xff]  ;;  %2726 = vmatmul.msk.f32.vlgmr.msra.gmra.mxu0 %vm670_vm1, %v3329_v3  ;;  %s643_s24 = sadd.s32 %s2722_s20, %s2712_s18  ;;  %4446 = vst [vmem:[#allocation19_spill] sm:$0xff] %v3352_v6  ;;  %v3363_v8 = vld [vmem:[%s3317_s22 + $0x28] sm:$0xff]  ;;  %v3383_v12 = vld [vmem:[%s3317_s22 + $0x30] sm:$0xff] }
  0x31   : > { %2730 = vmatmul.msk.f32.vlgmr.msra.gmra.mxu1 %vm670_vm1, %v3340_v4  ;;  %s2724_s28 = sshll.u32 %s643_s24, 3  ;;  %4447 = vst [vmem:[#allocation20_spill] sm:$0xff] %v3374_v9  ;;  %v3394_v13 = vld [vmem:[%s3317_s22 + $0x58] sm:$0xff] }
  0x32   : > { %s3357_s17 = scalar_lea.vmem %s4389_s2, %s2724_s28  ;;  %4448 = vst [vmem:[#allocation21_spill] sm:$0xff] %v3377_v10  ;;  %v3397_v14 = vld [vmem:[%s3317_s22 + $0x78] sm:$0xff] }
  0x33   : > { %4449 = vst [vmem:[#allocation22_spill] sm:$0xff] %v3394_v13  ;;  %v3400_v15 = vld [vmem:[%s3317_s22 + $0x18] sm:$0xff] }
  0x34   : > { %4450 = vst [vmem:[#allocation23_spill] sm:$0xff] %v3397_v14  ;;  %v3403_v16 = vld [vmem:[%s3317_s22 + $0x38] sm:$0xff] }
  0x36   : > { %2735 = vmatmul.msk.f32.gmra.mxu2 %vm670_vm1, %v3349_v5 }
  0x37   : > { %2739 = vmatmul.msk.f32.gmra.mxu3 %vm670_vm1, %v3352_v6 }
  0x38   : > { %2727 = vmatmul.msk.f32.gmra.mxu0 %vm670_vm1, %v3360_v7 }
  0x39   : > { %2731 = vmatmul.msk.f32.gmra.mxu1 %vm670_vm1, %v3363_v8 }
  0x3e   : > { %2736 = vmatmul.msk.f32.gmra.mxu2 %vm670_vm1, %v3374_v9 }
  0x3f   : > { %2740 = vmatmul.msk.f32.gmra.mxu3 %vm670_vm1, %v3377_v10 }
  0x40   : > { %2728 = vmatmul.msk.f32.gmra.mxu0 %vm670_vm1, %v3380_v11 }
  0x41   : > { %2732 = vmatmul.msk.f32.gmra.mxu1 %vm670_vm1, %v3383_v12 }
  0x46   : > { %2737 = vmatmul.msk.f32.gmra.mxu2 %vm670_vm1, %v3394_v13 }
  0x47   : > { %2741 = vmatmul.msk.f32.gmra.mxu3 %vm670_vm1, %v3397_v14 }
  0x48   : > { %2729 = vmatmul.msk.f32.gmra.mxu0 %vm670_vm1, %v3400_v15 }
  0x49   : > { %2733 = vmatmul.msk.f32.gmra.mxu1 %vm670_vm1, %v3403_v16 }
  0xad   : > { %v740_v19 = vpop.f32.mrf.mxu0 }
  0xae   : > { %v752_v20 = vpop.f32.mrf.mxu1  ;;  %v791_v21 = vmul.f32 %v3416_v17, %v740_v19 }
  0xaf   : > { %v795_v22 = vmul.f32 %v3416_v17, %v752_v20 }
  0xb0   : > { %v810_v23 = vadd.f32 %v3421_v18, %v791_v21 }
  0xb1   : > { %v814_v24 = vadd.f32 %v3421_v18, %v795_v22  ;;  %v764_v27 = vpop.f32.mrf.mxu2 }
  0xb2   : > { %v826_v25 = vmax.f32 %v810_v23, 0.0  ;;  %v776_v28 = vpop.f32.mrf.mxu3  ;;  %v799_v29 = vmul.f32 %v3416_v17, %v764_v27 }
  0xb3   : > { %v830_v26 = vmax.f32 %v814_v24, 0.0  ;;  %v803_v30 = vmul.f32 %v3416_v17, %v776_v28 }
  0xb4   : > { %843 = vst.msk [vmem:[#allocation2 + $0x10] sm:$0xff] %vm842_vm2, %v826_v25  ;;  %v818_v31 = vadd.f32 %v3421_v18, %v799_v29 }
  0xb5   : > { %847 = vst.msk [vmem:[#allocation2 + $0x30] sm:$0xff] %vm842_vm2, %v830_v26  ;;  %v822_v32 = vadd.f32 %v3421_v18, %v803_v30  ;;  %v743_v33 = vpop.f32.mrf.mxu0 }
  0xb6   : > { %v755_v34 = vpop.f32.mrf.mxu1  ;;  %v792_v35 = vmul.f32 %v3416_v17, %v743_v33  ;;  %v834_v37 = vmax.f32 %v818_v31, 0.0 }
  0xb7   : > { %v796_v36 = vmul.f32 %v3416_v17, %v755_v34  ;;  %v838_v38 = vmax.f32 %v822_v32, 0.0 }
  0xb8   : > { %v811_v39 = vadd.f32 %v3421_v18, %v792_v35  ;;  %851 = vst.msk [vmem:[#allocation2 + $0x50] sm:$0xff] %vm842_vm2, %v834_v37 }
  0xb9   : > { %v815_v40 = vadd.f32 %v3421_v18, %v796_v36  ;;  %855 = vst.msk [vmem:[#allocation2 + $0x70] sm:$0xff] %vm842_vm2, %v838_v38  ;;  %v767_v43 = vpop.f32.mrf.mxu2 }
  0xba   : > { %v827_v41 = vmax.f32 %v811_v39, 0.0  ;;  %v779_v44 = vpop.f32.mrf.mxu3  ;;  %v800_v45 = vmul.f32 %v3416_v17, %v767_v43 }
  0xbb   : > { %v831_v42 = vmax.f32 %v815_v40, 0.0  ;;  %v804_v46 = vmul.f32 %v3416_v17, %v779_v44 }
  0xbc   : > { %844 = vst.msk [vmem:[#allocation2 + $0x18] sm:$0xff] %vm842_vm2, %v827_v41  ;;  %v819_v47 = vadd.f32 %v3421_v18, %v800_v45 }
  0xbd   : > { %848 = vst.msk [vmem:[#allocation2 + $0x38] sm:$0xff] %vm842_vm2, %v831_v42  ;;  %v823_v48 = vadd.f32 %v3421_v18, %v804_v46  ;;  %v746_v49 = vpop.f32.mrf.mxu0 }
  0xbe   : > { %v758_v50 = vpop.f32.mrf.mxu1  ;;  %v793_v51 = vmul.f32 %v3416_v17, %v746_v49  ;;  %v835_v53 = vmax.f32 %v819_v47, 0.0 }
  0xbf   : > { %v797_v52 = vmul.f32 %v3416_v17, %v758_v50  ;;  %v839_v54 = vmax.f32 %v823_v48, 0.0 }
  0xc0   : > { %v812_v55 = vadd.f32 %v3421_v18, %v793_v51  ;;  %852 = vst.msk [vmem:[#allocation2 + $0x58] sm:$0xff] %vm842_vm2, %v835_v53 }
  0xc1   : > { %v816_v56 = vadd.f32 %v3421_v18, %v797_v52  ;;  %856 = vst.msk [vmem:[#allocation2 + $0x78] sm:$0xff] %vm842_vm2, %v839_v54  ;;  %v770_v59 = vpop.f32.mrf.mxu2 }
  0xc2   : > { %v828_v57 = vmax.f32 %v812_v55, 0.0  ;;  %v782_v60 = vpop.f32.mrf.mxu3  ;;  %v801_v61 = vmul.f32 %v3416_v17, %v770_v59 }
  0xc3   : > { %v832_v58 = vmax.f32 %v816_v56, 0.0  ;;  %v805_v62 = vmul.f32 %v3416_v17, %v782_v60 }
  0xc4   : > { %845 = vst.msk [vmem:[#allocation2 + $0x20] sm:$0xff] %vm842_vm2, %v828_v57  ;;  %v820_v63 = vadd.f32 %v3421_v18, %v801_v61 }
  0xc5   : > { %849 = vst.msk [vmem:[#allocation2 + $0x40] sm:$0xff] %vm842_vm2, %v832_v58  ;;  %v824_v19 = vadd.f32 %v3421_v18, %v805_v62  ;;  %v749_v20 = vpop.f32.mrf.mxu0 }
  0xc6   : > { %v761_v21 = vpop.f32.mrf.mxu1  ;;  %v794_v22 = vmul.f32 %v3416_v17, %v749_v20  ;;  %v836_v24 = vmax.f32 %v820_v63, 0.0 }
  0xc7   : > { %v798_v23 = vmul.f32 %v3416_v17, %v761_v21  ;;  %v840_v25 = vmax.f32 %v824_v19, 0.0 }
  0xc8   : > { %v813_v26 = vadd.f32 %v3421_v18, %v794_v22  ;;  %853 = vst.msk [vmem:[#allocation2 + $0x60] sm:$0xff] %vm842_vm2, %v836_v24 }
  0xc9   : > { %v817_v27 = vadd.f32 %v3421_v18, %v798_v23  ;;  %857 = vst.msk [vmem:[#allocation2 + $0x80] sm:$0xff] %vm842_vm2, %v840_v25  ;;  %v773_v30 = vpop.f32.mrf.mxu2 }
  0xca   : > { %v829_v28 = vmax.f32 %v813_v26, 0.0  ;;  %v785_v31 = vpop.f32.mrf.mxu3  ;;  %v802_v32 = vmul.f32 %v3416_v17, %v773_v30 }
  0xcb   : > { %v833_v29 = vmax.f32 %v817_v27, 0.0  ;;  %v806_v33 = vmul.f32 %v3416_v17, %v785_v31 }
  0xcc   : > { %846 = vst.msk [vmem:[#allocation2 + $0x28] sm:$0xff] %vm842_vm2, %v829_v28  ;;  %v821_v34 = vadd.f32 %v3421_v18, %v802_v32 }
  0xcd   : > { %850 = vst.msk [vmem:[#allocation2 + $0x48] sm:$0xff] %vm842_vm2, %v833_v29  ;;  %v825_v35 = vadd.f32 %v3421_v18, %v806_v33  ;;  %862 = sbr.rel (%p2742_p4) target bundleno = 213 (0xd5), region = 84 }
  0xce   : > { %v837_v36 = vmax.f32 %v821_v34, 0.0 }
  0xcf   : > { %v841_v37 = vmax.f32 %v825_v35, 0.0 }
  0xd0   : > { %854 = vst.msk [vmem:[#allocation2 + $0x68] sm:$0xff] %vm842_vm2, %v837_v36 }
  0xd1   : > { %858 = vst.msk [vmem:[#allocation2 + $0x88] sm:$0xff] %vm842_vm2, %v841_v37 }
  0xd2   : > { %v3134_v38 = vmov 0.0  }
  0xd3   : > { %863 = vst.msk [vmem:[#allocation2] sm:$0xff] %vm842_vm2, %v3134_v38 }
  0xd4   : > { %864 = vst.msk [vmem:[#allocation2 + $0x8] sm:$0xff] %vm842_vm2, %v3134_v38 }
  0xd5 PF: > { %p2743_p5 = scmp.le.s32.totalorder %s3116_s21, 0 }
  0xd7   : > { %868 = sbr.rel (%p2743_p5) target bundleno = 355 (0x163), region = 88 }
  0xdc   : > { %2744 = vmatpush.msk.msra.mxu0 %vm719_vm0, %v3292_v0  ;;  %2950 = vmatpush.msk.msra.mxu1 %vm719_vm0, %v3292_v0  ;;  %v869_v39 = vld [vmem:[%s3312_s25] sm:$0xff]  ;;  %v870_v40 = vld [vmem:[%s3312_s25 + $0x8] sm:$0xff] }
  0xdd   : > { %2745 = vmatmul.msk.f32.vlgmr.msra.gmra.mxu0 %vm670_vm1, %v869_v39  ;;  %2746 = vmatmul.msk.f32.vlgmr.msra.gmra.mxu1 %vm670_vm1, %v870_v40 }
 0x15a   : > { %v894_v41 = vpop.f32.mrf.mxu0  ;;  %v897_v42 = vpop.f32.mrf.mxu1 }
 0x15b   : > { %v900_v43 = vmul.f32 %v3416_v17, %v894_v41  ;;  %v901_v44 = vmul.f32 %v3416_v17, %v897_v42 }
 0x15d   : > { %v902_v45 = vadd.f32 %v3421_v18, %v900_v43  ;;  %v903_v46 = vadd.f32 %v3421_v18, %v901_v44 }
 0x15f   : > { %v904_v47 = vmax.f32 %v902_v45, 0.0  ;;  %v905_v48 = vmax.f32 %v903_v46, 0.0 }
 0x161   : > { %906 = vst.msk [vmem:[#allocation2] sm:$0xff] %vm842_vm2, %v904_v47 }
 0x162   : > { %907 = vst.msk [vmem:[#allocation2 + $0x8] sm:$0xff] %vm842_vm2, %v905_v48 }
 0x163 PF: > { %p2747_p6 = scmp.ne.s32.totalorder %s3116_s21, 1 }
 0x165   : > { %911 = sbr.rel (%p2747_p6) target bundleno = 365 (0x16d), region = 92 }
 0x16a   : > { %v3135_v49 = vmov 0.0  }
 0x16b   : > { %912 = vst.msk [vmem:[#allocation2 + $0x90] sm:$0xff] %vm842_vm2, %v3135_v49 }
 0x16c   : > { %913 = vst.msk [vmem:[#allocation2 + $0x98] sm:$0xff] %vm842_vm2, %v3135_v49 }
 0x16d PF: > { %p2748_p7 = scmp.ge.s32.totalorder %s3116_s21, 1 }
 0x16f   : > { %917 = sbr.rel (%p2748_p7) target bundleno = 507 (0x1fb), region = 96 }
 0x174   : > { %2749 = vmatpush.msk.msra.mxu0 %vm719_vm0, %v3292_v0  ;;  %2951 = vmatpush.msk.msra.mxu1 %vm719_vm0, %v3292_v0  ;;  %v918_v50 = vld [vmem:[%s3357_s17] sm:$0xff]  ;;  %v919_v51 = vld [vmem:[%s3357_s17 + $0x8] sm:$0xff] }
 0x175   : > { %2750 = vmatmul.msk.f32.vlgmr.msra.gmra.mxu0 %vm670_vm1, %v918_v50  ;;  %2751 = vmatmul.msk.f32.vlgmr.msra.gmra.mxu1 %vm670_vm1, %v919_v51 }
 0x1f2   : > { %v943_v52 = vpop.f32.mrf.mxu0  ;;  %v946_v53 = vpop.f32.mrf.mxu1 }
 0x1f3   : > { %v949_v54 = vmul.f32 %v3416_v17, %v943_v52  ;;  %v950_v55 = vmul.f32 %v3416_v17, %v946_v53 }
 0x1f5   : > { %v951_v56 = vadd.f32 %v3421_v18, %v949_v54  ;;  %v952_v57 = vadd.f32 %v3421_v18, %v950_v55 }
 0x1f7   : > { %v953_v58 = vmax.f32 %v951_v56, 0.0  ;;  %v954_v59 = vmax.f32 %v952_v57, 0.0 }
 0x1f9   : > { %955 = vst.msk [vmem:[#allocation2 + $0x90] sm:$0xff] %vm842_vm2, %v953_v58 }
 0x1fa   : > { %956 = vst.msk [vmem:[#allocation2 + $0x98] sm:$0xff] %vm842_vm2, %v954_v59 }
 0x1fb PF: > { %v2753_v0 = vld [vmem:[%s4393_s6 + $0x20] sm:$0xff]  ;;  %v3513_v60 = vld [vmem:[#allocation2 + $0x70] sm:$0xff]  ;;  %v2752_v17 = vld [vmem:[%s4393_s6 + $0x8] sm:$0xff]  ;;  %s4481_s28 = sld [smem:[#allocation36_spill]]  ;;  %s2946_s16 = sshll.u32 %s3116_s21, 4 }
 0x1fc   : > { %2952 = vmatpush.msra.mxu3 %v2753_v0  ;;  %v2786_v18 = vld [vmem:[%s4393_s6 + $0x38] sm:$0xff]  ;;  %v3521_v61 = vld [vmem:[#allocation2 + $0x20] sm:$0xff]  ;;  %1251 = vmatpush.msra.mxu0 %v2753_v0  ;;  %v3523_v62 = vld [vmem:[#allocation2 + $0x10] sm:$0xff]  ;;  %s4482_s29 = sld [smem:[#allocation8_spill]]  ;;  %s2562_s3 = sshll.u32 %s3472_s26, 4  ;;  %s2563_s3 = int_to_ptr.vmem [resolvable:$true] %s2562_s3 }
 0x1fd   : > { %2766 = vmatmul.msk.f32.vlgmr.msra.gmra.mxu3 %vm842_vm2, %v3513_v60  ;;  %1453 = vmatpush.msra.mxu2 %v2786_v18  ;;  %v3527_v63 = vld [vmem:[#allocation2] sm:$0xff]  ;;  %v2836_v20 = vld [vmem:[%s4393_s6 + $0x30] sm:$0xff]  ;;  %v3541_v21 = vld [vmem:[#allocation2 + $0x78] sm:$0xff]  ;;  %s4483_s22 = sld [smem:[#allocation37_spill]]  ;;  %s2547_s24 = scalar_lea.sflag [#allocation4], %s602_s27 }
 0x1fe   : > { %v1535_v19 = vld [vmem:[%s4393_s6] sm:$0xff]  ;;  %2953 = vmatpush.msrb.mxu3 %v2752_v17  ;;  %2787 = vmatmul.msk.f32.vlgmr.msra.gmra.mxu2 %vm842_vm2, %v3521_v61  ;;  %v3543_v22 = vld [vmem:[#allocation2 + $0x28] sm:$0xff]  ;;  %v3545_v23 = vld [vmem:[#allocation2 + $0x18] sm:$0xff] }
 0x1ff   : > { %2754 = vmatmul.msk.f32.vlgmr.msra.gmra.mxu0 %vm842_vm2, %v3523_v62  ;;  %1322 = vmatpush.msra.mxu1 %v2752_v17  ;;  %v3549_v24 = vld [vmem:[#allocation2 + $0x8] sm:$0xff]  ;;  %v3557_v25 = vld [vmem:[#allocation2 + $0x80] sm:$0xff]  ;;  %v3559_v26 = vld [vmem:[#allocation2 + $0x30] sm:$0xff] }
 0x200   : > { %2770 = vmatmul.msk.f32.vlgmr.msra.gmra.mxu1 %vm842_vm2, %v3527_v63  ;;  %1618 = vmatpush.msrb.mxu0 %v1535_v19  ;;  %v3569_v27 = vld [vmem:[#allocation2 + $0x88] sm:$0xff]  ;;  %v3571_v28 = vld [vmem:[#allocation2 + $0x38] sm:$0xff]  ;;  %v3581_v29 = vld [vmem:[#allocation2 + $0x60] sm:$0xff] }
 0x201   : > { %1685 = vmatpush.msrb.mxu1 %v2836_v20  ;;  %2954 = vmatpush.msra.mxu3 %v2786_v18  ;;  %v3583_v30 = vld [vmem:[#allocation2 + $0x40] sm:$0xff]  ;;  %v2803_v31 = vld [vmem:[%s4393_s6 + $0x18] sm:$0xff]  ;;  %v3596_v32 = vld [vmem:[#allocation2 + $0x68] sm:$0xff] }
 0x202   : > { %v3598_v33 = vld [vmem:[#allocation2 + $0x48] sm:$0xff]  ;;  %v3608_v34 = vld [vmem:[#allocation2 + $0x50] sm:$0xff]  ;;  %v3618_v35 = vld [vmem:[#allocation2 + $0x58] sm:$0xff]  ;;  %s2940_s17 = sshll.u32 %s4482_s29, 5 }
 0x203   : > { %v2853_v36 = vld [vmem:[%s4393_s6 + $0x10] sm:$0xff]  ;;  %v2887_v37 = vld [vmem:[%s4393_s6 + $0x40] sm:$0xff]  ;;  %v3660_v39 = vld [vmem:[#allocation2 + $0x98] sm:$0xff]  ;;  %s2559_s18 = sadd.s32 %s2946_s16, %s2940_s17  ;;  %s4484_s15 = smov %s4483_s22 }
 0x204   : > { %2015 = vmatpush.msra.mxu0 %v2887_v37  ;;  %v3650_v38 = vld [vmem:[#allocation2 + $0x90] sm:$0xff]  ;;  %4452 = vst [vmem:[#allocation25_spill] sm:$0xff] %v3660_v39  ;;  %v2854_v40 = vld [vmem:[%s4393_s6 + $0x28] sm:$0xff]  ;;  %s2941_s23 = sshll.u32 %s2559_s18, 3  ;;  %s3058_s18 = scalar_lea.hbm %s4484_s15, 512 }
 0x205   : > { %2767 = vmatmul.msk.f32.gmra.mxu3 %vm842_vm2, %v3541_v21  ;;  %4451 = vst [vmem:[#allocation24_spill] sm:$0xff] %v3650_v38  ;;  %1883 = vmatpush.msrb.mxu2 %v2854_v40  ;;  %s2561_s25 = scalar_lea.hbm %s4483_s22, %s2941_s23 }
 0x206   : > { %2788 = vmatmul.msk.f32.gmra.mxu2 %vm842_vm2, %v3543_v22  ;;  %s2564_s20 = sshll.u32 %s2561_s25, 4  ;;  %s2565_s20 = int_to_ptr.hbm [resolvable:$true] %s2564_s20 }
 0x207   : > { %2755 = vmatmul.msk.f32.gmra.mxu0 %vm842_vm2, %v3545_v23 }
 0x208   : > { %2771 = vmatmul.msk.f32.gmra.mxu1 %vm842_vm2, %v3549_v24 }
 0x20d   : > { %2768 = vmatmul.msk.f32.gmra.mxu3 %vm842_vm2, %v3557_v25 }
 0x20e   : > { %2789 = vmatmul.msk.f32.gmra.mxu2 %vm842_vm2, %v3559_v26 }
 0x20f   : > { %2756 = vmatmul.msk.f32.gmra.mxu0 %vm842_vm2, %v3521_v61 }
 0x210   : > { %2772 = vmatmul.msk.f32.gmra.mxu1 %vm842_vm2, %v3523_v62 }
 0x215   : > { %2769 = vmatmul.msk.f32.gmra.mxu3 %vm842_vm2, %v3569_v27 }
 0x216   : > { %2790 = vmatmul.msk.f32.gmra.mxu2 %vm842_vm2, %v3571_v28 }
 0x217   : > { %2757 = vmatmul.msk.f32.gmra.mxu0 %vm842_vm2, %v3543_v22 }
 0x218   : > { %2773 = vmatmul.msk.f32.gmra.mxu1 %vm842_vm2, %v3545_v23 }
 0x21d   : > { %2782 = vmatmul.msk.f32.vlgmr.msrb.gmra.mxu3 %vm842_vm2, %v3581_v29 }
 0x21e   : > { %2791 = vmatmul.msk.f32.gmra.mxu2 %vm842_vm2, %v3583_v30  ;;  %1553 = vmatpush.msrb.mxu3 %v2803_v31 }
 0x21f   : > { %2758 = vmatmul.msk.f32.gmra.mxu0 %vm842_vm2, %v3559_v26 }
 0x220   : > { %2774 = vmatmul.msk.f32.gmra.mxu1 %vm842_vm2, %v3521_v61 }
 0x225   : > { %2783 = vmatmul.msk.f32.gmra.mxu3 %vm842_vm2, %v3596_v32 }
 0x226   : > { %2792 = vmatmul.msk.f32.gmra.mxu2 %vm842_vm2, %v3598_v33 }
 0x227   : > { %2759 = vmatmul.msk.f32.gmra.mxu0 %vm842_vm2, %v3571_v28 }
 0x228   : > { %2775 = vmatmul.msk.f32.gmra.mxu1 %vm842_vm2, %v3543_v22 }
 0x22d   : > { %2784 = vmatmul.msk.f32.gmra.mxu3 %vm842_vm2, %v3513_v60 }
 0x22e   : > { %2793 = vmatmul.msk.f32.gmra.mxu2 %vm842_vm2, %v3608_v34 }
 0x22f   : > { %2760 = vmatmul.msk.f32.gmra.mxu0 %vm842_vm2, %v3583_v30 }
 0x230   : > { %2776 = vmatmul.msk.f32.gmra.mxu1 %vm842_vm2, %v3559_v26 }
 0x235   : > { %2785 = vmatmul.msk.f32.gmra.mxu3 %vm842_vm2, %v3541_v21 }
 0x236   : > { %2794 = vmatmul.msk.f32.gmra.mxu2 %vm842_vm2, %v3618_v35 }
 0x237   : > { %2761 = vmatmul.msk.f32.gmra.mxu0 %vm842_vm2, %v3598_v33 }
 0x238   : > { %2777 = vmatmul.msk.f32.gmra.mxu1 %vm842_vm2, %v3571_v28 }
 0x23d   : > { %2799 = vmatmul.msk.f32.vlgmr.msra.gmra.mxu3 %vm842_vm2, %v3557_v25 }
 0x23e   : > { %2795 = vmatmul.msk.f32.gmra.mxu2 %vm842_vm2, %v3581_v29  ;;  %1948 = vmatpush.msra.mxu3 %v2853_v36 }
 0x23f   : > { %2762 = vmatmul.msk.f32.gmra.mxu0 %vm842_vm2, %v3608_v34 }
 0x240   : > { %2778 = vmatmul.msk.f32.gmra.mxu1 %vm842_vm2, %v3583_v30 }
 0x245   : > { %2800 = vmatmul.msk.f32.gmra.mxu3 %vm842_vm2, %v3569_v27 }
 0x246   : > { %2796 = vmatmul.msk.f32.gmra.mxu2 %vm842_vm2, %v3596_v32 }
 0x247   : > { %2763 = vmatmul.msk.f32.gmra.mxu0 %vm842_vm2, %v3618_v35 }
 0x248   : > { %2779 = vmatmul.msk.f32.gmra.mxu1 %vm842_vm2, %v3598_v33 }
 0x24d   : > { %2801 = vmatmul.msk.f32.gmra.mxu3 %vm842_vm2, %v3650_v38 }
 0x24e   : > { %2797 = vmatmul.msk.f32.gmra.mxu2 %vm842_vm2, %v3513_v60 }
 0x24f   : > { %2764 = vmatmul.msk.f32.gmra.mxu0 %vm842_vm2, %v3581_v29 }
 0x250   : > { %2780 = vmatmul.msk.f32.gmra.mxu1 %vm842_vm2, %v3608_v34 }
 0x255   : > { %2802 = vmatmul.msk.f32.gmra.mxu3 %vm842_vm2, %v3660_v39 }
 0x256   : > { %2798 = vmatmul.msk.f32.gmra.mxu2 %vm842_vm2, %v3541_v21 }
 0x257   : > { %2765 = vmatmul.msk.f32.gmra.mxu0 %vm842_vm2, %v3596_v32 }
 0x258   : > { %2781 = vmatmul.msk.f32.gmra.mxu1 %vm842_vm2, %v3618_v35 }
 0x25d   : > { %2804 = vmatmul.msk.f32.vlgmr.msrb.gmra.mxu3 %vm842_vm2, %v3523_v62 }
 0x25e   : > { %2855 = vmatmul.msk.f32.vlgmr.msrb.gmra.mxu2 %vm842_vm2, %v3523_v62 }
 0x25f   : > { %2820 = vmatmul.msk.f32.vlgmr.msrb.gmra.mxu0 %vm842_vm2, %v3527_v63 }
 0x260   : > { %2837 = vmatmul.msk.f32.vlgmr.msrb.gmra.mxu1 %vm842_vm2, %v3521_v61 }
 0x265   : > { %2805 = vmatmul.msk.f32.gmra.mxu3 %vm842_vm2, %v3545_v23 }
 0x266   : > { %2856 = vmatmul.msk.f32.gmra.mxu2 %vm842_vm2, %v3545_v23 }
 0x267   : > { %2821 = vmatmul.msk.f32.gmra.mxu0 %vm842_vm2, %v3549_v24 }
 0x268   : > { %2838 = vmatmul.msk.f32.gmra.mxu1 %vm842_vm2, %v3543_v22 }
 0x26d   : > { %2806 = vmatmul.msk.f32.gmra.mxu3 %vm842_vm2, %v3521_v61 }
 0x26e   : > { %2857 = vmatmul.msk.f32.gmra.mxu2 %vm842_vm2, %v3521_v61 }
 0x26f   : > { %2822 = vmatmul.msk.f32.gmra.mxu0 %vm842_vm2, %v3523_v62 }
 0x270   : > { %2839 = vmatmul.msk.f32.gmra.mxu1 %vm842_vm2, %v3559_v26 }
 0x275   : > { %2807 = vmatmul.msk.f32.gmra.mxu3 %vm842_vm2, %v3543_v22 }
 0x276   : > { %2858 = vmatmul.msk.f32.gmra.mxu2 %vm842_vm2, %v3543_v22 }
 0x277   : > { %2823 = vmatmul.msk.f32.gmra.mxu0 %vm842_vm2, %v3545_v23 }
 0x278   : > { %2840 = vmatmul.msk.f32.gmra.mxu1 %vm842_vm2, %v3571_v28 }
 0x27c   : > { %v3705_v41 = vpop.f32.mrf.mxu0 }
 0x27d   : > { %4453 = vst [vmem:[#allocation26_spill] sm:$0xff] %v3705_v41  ;;  %2808 = vmatmul.msk.f32.gmra.mxu3 %vm842_vm2, %v3559_v26  ;;  %v3709_v42 = vpop.f32.mrf.mxu1 }
 0x27e   : > { %4454 = vst [vmem:[#allocation27_spill] sm:$0xff] %v3709_v42  ;;  %2859 = vmatmul.msk.f32.gmra.mxu2 %vm842_vm2, %v3559_v26 }
 0x27f   : > { %2824 = vmatmul.msk.f32.gmra.mxu0 %vm842_vm2, %v3521_v61 }
 0x280   : > { %v1289_v43 = vpop.f32.mrf.mxu3  ;;  %2841 = vmatmul.msk.f32.gmra.mxu1 %vm842_vm2, %v3583_v30 }
 0x281   : > { %v3777_v0 = vpop.f32.mrf.mxu2 }
 0x282   : > { %4455 = vst [vmem:[#allocation28_spill] sm:$0xff] %v3777_v0 }
 0x284   : > { %v3717_v44 = vpop.f32.mrf.mxu0 }
 0x285   : > { %2809 = vmatmul.msk.f32.gmra.mxu3 %vm842_vm2, %v3571_v28  ;;  %v3721_v45 = vpop.f32.mrf.mxu1 }
 0x286   : > { %2860 = vmatmul.msk.f32.gmra.mxu2 %vm842_vm2, %v3571_v28 }
 0x287   : > { %2825 = vmatmul.msk.f32.gmra.mxu0 %vm842_vm2, %v3543_v22 }
 0x288   : > { %v1292_v46 = vpop.f32.mrf.mxu3  ;;  %2842 = vmatmul.msk.f32.gmra.mxu1 %vm842_vm2, %v3598_v33 }
 0x289   : > { %v3791_v36 = vpop.f32.mrf.mxu2 }
 0x28c   : > { %v3729_v47 = vpop.f32.mrf.mxu0 }
 0x28d   : > { %2810 = vmatmul.msk.f32.gmra.mxu3 %vm842_vm2, %v3583_v30  ;;  %v3733_v48 = vpop.f32.mrf.mxu1 }
 0x28e   : > { %2861 = vmatmul.msk.f32.gmra.mxu2 %vm842_vm2, %v3583_v30 }
 0x28f   : > { %2826 = vmatmul.msk.f32.gmra.mxu0 %vm842_vm2, %v3559_v26 }
 0x290   : > { %v1295_v49 = vpop.f32.mrf.mxu3  ;;  %2843 = vmatmul.msk.f32.gmra.mxu1 %vm842_vm2, %v3608_v34 }
 0x294   : > { %v3741_v50 = vpop.f32.mrf.mxu0 }
 0x295   : > { %2811 = vmatmul.msk.f32.gmra.mxu3 %vm842_vm2, %v3598_v33  ;;  %v3745_v51 = vpop.f32.mrf.mxu1 }
 0x296   : > { %2862 = vmatmul.msk.f32.gmra.mxu2 %vm842_vm2, %v3598_v33 }
 0x297   : > { %2827 = vmatmul.msk.f32.gmra.mxu0 %vm842_vm2, %v3571_v28 }
 0x298   : > { %v1298_v52 = vpop.f32.mrf.mxu3  ;;  %2844 = vmatmul.msk.f32.gmra.mxu1 %vm842_vm2, %v3618_v35 }
 0x29c   : > { %v3753_v53 = vpop.f32.mrf.mxu0 }
 0x29d   : > { %2812 = vmatmul.msk.f32.gmra.mxu3 %vm842_vm2, %v3608_v34  ;;  %v3757_v54 = vpop.f32.mrf.mxu1 }
 0x29e   : > { %2863 = vmatmul.msk.f32.gmra.mxu2 %vm842_vm2, %v3608_v34 }
 0x29f   : > { %2828 = vmatmul.msk.f32.gmra.mxu0 %vm842_vm2, %v3583_v30 }
 0x2a0   : > { %v1360_v55 = vpop.f32.mrf.mxu3  ;;  %2845 = vmatmul.msk.f32.gmra.mxu1 %vm842_vm2, %v3581_v29 }
 0x2a1   : > { %v1361_v56 = vadd.f32 %v1360_v55, %v1289_v43  ;;  %v3807_v55 = vpop.f32.mrf.mxu2 }
 0x2a4   : > { %v3765_v57 = vpop.f32.mrf.mxu0 }
 0x2a5   : > { %2813 = vmatmul.msk.f32.gmra.mxu3 %vm842_vm2, %v3618_v35  ;;  %v3769_v58 = vpop.f32.mrf.mxu1 }
 0x2a6   : > { %2864 = vmatmul.msk.f32.gmra.mxu2 %vm842_vm2, %v3618_v35 }
 0x2a7   : > { %2829 = vmatmul.msk.f32.gmra.mxu0 %vm842_vm2, %v3598_v33 }
 0x2a8   : > { %v1363_v59 = vpop.f32.mrf.mxu3  ;;  %2846 = vmatmul.msk.f32.gmra.mxu1 %vm842_vm2, %v3596_v32 }
 0x2a9   : > { %v1364_v17 = vadd.f32 %v1363_v59, %v1292_v46  ;;  %v3827_v10 = vpop.f32.mrf.mxu2 }
 0x2ac   : > { %v3779_v18 = vpop.f32.mrf.mxu0 }
 0x2ad   : > { %2814 = vmatmul.msk.f32.gmra.mxu3 %vm842_vm2, %v3581_v29  ;;  %v3783_v19 = vpop.f32.mrf.mxu1 }
 0x2ae   : > { %2865 = vmatmul.msk.f32.gmra.mxu2 %vm842_vm2, %v3581_v29 }
 0x2af   : > { %2830 = vmatmul.msk.f32.gmra.mxu0 %vm842_vm2, %v3608_v34 }
 0x2b0   : > { %v1366_v20 = vpop.f32.mrf.mxu3  ;;  %2847 = vmatmul.msk.f32.gmra.mxu1 %vm842_vm2, %v3513_v60 }
 0x2b1   : > { %v1367_v31 = vadd.f32 %v1366_v20, %v1295_v49  ;;  %v3849_v42 = vpop.f32.mrf.mxu2 }
 0x2b4   : > { %v3793_v37 = vpop.f32.mrf.mxu0 }
 0x2b5   : > { %2815 = vmatmul.msk.f32.gmra.mxu3 %vm842_vm2, %v3596_v32  ;;  %v3797_v40 = vpop.f32.mrf.mxu1 }
 0x2b6   : > { %2866 = vmatmul.msk.f32.gmra.mxu2 %vm842_vm2, %v3596_v32 }
 0x2b7   : > { %2831 = vmatmul.msk.f32.gmra.mxu0 %vm842_vm2, %v3618_v35 }
 0x2b8   : > { %v1369_v43 = vpop.f32.mrf.mxu3  ;;  %2848 = vmatmul.msk.f32.gmra.mxu1 %vm842_vm2, %v3541_v21 }
 0x2b9   : > { %v1370_v46 = vadd.f32 %v1369_v43, %v1298_v52 }
 0x2bc   : > { %v3805_v49 = vpop.f32.mrf.mxu0 }
 0x2bd   : > { %2816 = vmatmul.msk.f32.gmra.mxu3 %vm842_vm2, %v3513_v60  ;;  %v3811_v59 = vpop.f32.mrf.mxu1 }
 0x2be   : > { %2867 = vmatmul.msk.f32.gmra.mxu2 %vm842_vm2, %v3513_v60 }
 0x2bf   : > { %2832 = vmatmul.msk.f32.gmra.mxu0 %vm842_vm2, %v3581_v29 }
 0x2c0   : > { %v1491_v20 = vpop.f32.mrf.mxu3  ;;  %2849 = vmatmul.msk.f32.gmra.mxu1 %vm842_vm2, %v3557_v25 }
 0x2c1   : > { %v3819_v52 = vadd.f32 %v1491_v20, %v1361_v56 }
 0x2c3   : > { %4456 = vst [vmem:[#allocation29_spill] sm:$0xff] %v3819_v52 }
 0x2c4   : > { %v3821_v43 = vpop.f32.mrf.mxu0 }
 0x2c5   : > { %2817 = vmatmul.msk.f32.gmra.mxu3 %vm842_vm2, %v3541_v21  ;;  %v3825_v14 = vpop.f32.mrf.mxu1 }
 0x2c6   : > { %2868 = vmatmul.msk.f32.gmra.mxu2 %vm842_vm2, %v3541_v21 }
 0x2c7   : > { %2833 = vmatmul.msk.f32.gmra.mxu0 %vm842_vm2, %v3596_v32 }
 0x2c8   : > { %v1494_v6 = vpop.f32.mrf.mxu3  ;;  %2850 = vmatmul.msk.f32.gmra.mxu1 %vm842_vm2, %v3569_v27 }
 0x2c9   : > { %v3835_v56 = vadd.f32 %v1494_v6, %v1364_v17 }
 0x2cb   : > { %4457 = vst [vmem:[#allocation30_spill] sm:$0xff] %v3835_v56 }
 0x2cc   : > { %v3837_v20 = vpop.f32.mrf.mxu0 }
 0x2cd   : > { %2818 = vmatmul.msk.f32.gmra.mxu3 %vm842_vm2, %v3557_v25  ;;  %v3841_v2 = vpop.f32.mrf.mxu1 }
 0x2ce   : > { %2869 = vmatmul.msk.f32.gmra.mxu2 %vm842_vm2, %v3557_v25 }
 0x2cf   : > { %2834 = vmatmul.msk.f32.gmra.mxu0 %vm842_vm2, %v3513_v60 }
 0x2d0   : > { %v1497_v0 = vpop.f32.mrf.mxu3  ;;  %2851 = vmatmul.msk.f32.gmra.mxu1 %vm842_vm2, %v3650_v38 }
 0x2d1   : > { %v3851_v6 = vadd.f32 %v1497_v0, %v1367_v31  ;;  %v2388_v0 = vld [vmem:[%s4399_s12] sm:$0xf] }
 0x2d2   : > { %2920 = vmatpush.msk.msra.mxu2 %vm719_vm0, %v2388_v0 }
 0x2d3   : > { %4458 = vst [vmem:[#allocation31_spill] sm:$0xff] %v3851_v6 }
 0x2d4   : > { %v3853_v17 = vpop.f32.mrf.mxu0 }
 0x2d5   : > { %4459 = vst [vmem:[#allocation32_spill] sm:$0xff] %v3853_v17  ;;  %2819 = vmatmul.msk.f32.gmra.mxu3 %vm842_vm2, %v3569_v27  ;;  %v3857_v41 = vpop.f32.mrf.mxu1  ;;  %v3874_v17 = vpop.f32.mrf.mxu2 }
 0x2d6   : > { %4460 = vst [vmem:[#allocation33_spill] sm:$0xff] %v3857_v41  ;;  %2870 = vmatmul.msk.f32.gmra.mxu2 %vm842_vm2, %v3569_v27  ;;  %v2234_v41 = vld [vmem:[%s4396_s9] sm:$0xff] }
 0x2d7   : > { %2835 = vmatmul.msk.f32.gmra.mxu0 %vm842_vm2, %v3541_v21  ;;  %2298 = vmatpush.msra.mxu1 %v2234_v41 }
 0x2d8   : > { %v1500_v13 = vpop.f32.mrf.mxu3  ;;  %2852 = vmatmul.msk.f32.gmra.mxu1 %vm842_vm2, %v3660_v39 }
 0x2d9   : > { %v3868_v31 = vadd.f32 %v1500_v13, %v1370_v46 }
 0x2db   : > { %4461 = vst [vmem:[#allocation34_spill] sm:$0xff] %v3868_v31  ;;  %v957_v31 = vlaneseq }
 0x2dc   : > { %v1620_v6 = vpop.f32.mrf.mxu0 }
 0x2dd   : > { %2871 = vmatmul.msk.f32.vlgmr.msra.gmra.mxu3 %vm842_vm2, %v3527_v63  ;;  %v1687_v39 = vpop.f32.mrf.mxu1  ;;  %v3882_v9 = vpop.f32.mrf.mxu2  ;;  %v3890_v56 = vshrl.u32 %v957_v31, 7 }
 0x2de   : > { %2921 = vmatmul.msk.f32.vlgmr.msra.gmra.mxu2 %vm670_vm1, %v3329_v3 }
 0x2df   : > { %2888 = vmatmul.msk.f32.vlgmr.msra.gmra.mxu0 %vm842_vm2, %v3521_v61  ;;  %vm1767_vm3 = vcmp.lt.s32.totalorder %v3890_v56, 1  ;;  %vm2097_vm12 = vcmp.lt.s32.totalorder %v3890_v56, 7 }
 0x2e0   : > { %v1555_v13 = vpop.f32.mrf.mxu3 }
 0x2e1   : > { %v1621_v46 = vadd.f32 %v1620_v6, %v1555_v13  ;;  %v1328_v13 = vadd.f32 %v3721_v45, %v3717_v44 }
 0x2e3   : > { %v3892_v3 = vadd.f32 %v1687_v39, %v1621_v46  ;;  %v1504_v39 = vadd.f32 %v3791_v36, %v1328_v13  ;;  %v1331_v36 = vadd.f32 %v3733_v48, %v3729_v47 }
 0x2e4   : > { %v1623_v0 = vpop.f32.mrf.mxu0 }
 0x2e5   : > { %2872 = vmatmul.msk.f32.gmra.mxu3 %vm842_vm2, %v3549_v24  ;;  %v1690_v41 = vpop.f32.mrf.mxu1  ;;  %v4425_v52 = vrot.slane %v3892_v3, 7  ;;  %v3902_v46 = vpop.f32.mrf.mxu2 }
 0x2e6   : > { %2922 = vmatmul.msk.f32.gmra.mxu2 %vm670_vm1, %v3360_v7  ;;  %v960_v7 = vadd.s32 16, %v3890_v56 }
 0x2e7   : > { %2889 = vmatmul.msk.f32.gmra.mxu0 %vm842_vm2, %v3543_v22 }
 0x2e8   : > { %v1558_v63 = vpop.f32.mrf.mxu3 }
 0x2e9   : > { %v1624_v6 = vadd.f32 %v1623_v0, %v1558_v63  ;;  %v992_v0 = vand.u32 15, %v960_v7 }
 0x2eb   : > { %v1736_v38 = vadd.f32 %v1690_v41, %v1624_v6  ;;  %vm1521_vm4 = vcmp.gt.s32.totalorder %v992_v0, 0 }
 0x2ec   : > { %v1626_v24 = vpop.f32.mrf.mxu0 }
 0x2ed   : > { %v1752_v5 = vrot.slane %v1736_v38, 7  ;;  %2873 = vmatmul.msk.f32.gmra.mxu3 %vm842_vm2, %v3523_v62  ;;  %v1693_v31 = vpop.f32.mrf.mxu1 }
 0x2ee   : > { %2923 = vmatmul.msk.f32.gmra.mxu2 %vm670_vm1, %v3380_v11 }
 0x2ef   : > { %v1782_v44 = vsel %vm1767_vm3, %v4425_v52, %v1752_v5  ;;  %2890 = vmatmul.msk.f32.gmra.mxu0 %vm842_vm2, %v3559_v26  ;;  %v1505_v52 = vadd.f32 %v3807_v55, %v1331_v36 }
 0x2f0   : > { %v3912_v38 = vadd.f32 %v1782_v44, %v1504_v39  ;;  %v1561_v62 = vpop.f32.mrf.mxu3 }
 0x2f1   : > { %v1627_v45 = vadd.f32 %v1626_v24, %v1561_v62  ;;  %v3925_v24 = vpop.f32.mrf.mxu2 }
 0x2f3   : > { %v1737_v41 = vadd.f32 %v1693_v31, %v1627_v45 }
 0x2f4   : > { %v1629_v63 = vpop.f32.mrf.mxu0 }
 0x2f5   : > { %v1753_v6 = vrot.slane %v1737_v41, 7  ;;  %2874 = vmatmul.msk.f32.gmra.mxu3 %vm842_vm2, %v3545_v23  ;;  %v1696_v13 = vpop.f32.mrf.mxu1  ;;  %v1334_v23 = vadd.f32 %v3745_v51, %v3741_v50 }
 0x2f6   : > { %2924 = vmatmul.msk.f32.gmra.mxu2 %vm670_vm1, %v3400_v15 }
 0x2f7   : > { %v1781_v11 = vsel %vm1767_vm3, %v1752_v5, %v1753_v6  ;;  %2891 = vmatmul.msk.f32.gmra.mxu0 %vm842_vm2, %v3571_v28  ;;  %v962_v5 = vadd.s32 32, %v3890_v56  ;;  %v1506_v15 = vadd.f32 %v3827_v10, %v1334_v23 }
 0x2f8   : > { %v1818_v47 = vsel %vm1521_vm4, %v1781_v11, 0.0  ;;  %v1564_v48 = vpop.f32.mrf.mxu3 }
 0x2f9   : > { %v1630_v7 = vadd.f32 %v1629_v63, %v1564_v48  ;;  %v3927_v31 = vadd.f32 %v1818_v47, %v1505_v52  ;;  %v1006_v0 = vand.u32 15, %v962_v5  ;;  %v3945_v36 = vpop.f32.mrf.mxu2 }
 0x2fb   : > { %v1738_v55 = vadd.f32 %v1696_v13, %v1630_v7  ;;  %vm1523_vm5 = vcmp.gt.s32.totalorder %v1006_v0, 0 }
 0x2fc   : > { %v1632_v39 = vpop.f32.mrf.mxu0 }
 0x2fd   : > { %v1754_v44 = vrot.slane %v1738_v55, 7  ;;  %2875 = vmatmul.msk.f32.gmra.mxu3 %vm842_vm2, %v3521_v61  ;;  %v1699_v62 = vpop.f32.mrf.mxu1  ;;  %v1337_v61 = vadd.f32 %v3757_v54, %v3753_v53  ;;  %v964_v55 = vadd.s32 48, %v3890_v56 }
 0x2fe   : > { %2925 = vmatmul.msk.f32.gmra.mxu2 %vm670_vm1, %v3340_v4 }
 0x2ff   : > { %v1780_v45 = vsel %vm1767_vm3, %v1753_v6, %v1754_v44  ;;  %2892 = vmatmul.msk.f32.gmra.mxu0 %vm842_vm2, %v3583_v30  ;;  %v1507_v4 = vadd.f32 %v3849_v42, %v1337_v61 }
 0x300   : > { %v3941_v50 = vadd.f32 %v1780_v45, %v1506_v15  ;;  %v1567_v51 = vpop.f32.mrf.mxu3 }
 0x301   : > { %v1633_v52 = vadd.f32 %v1632_v39, %v1567_v51  ;;  %v3960_v42 = vpop.f32.mrf.mxu2 }
 0x303   : > { %v1739_v10 = vadd.f32 %v1699_v62, %v1633_v52  ;;  %v1020_v62 = vand.u32 15, %v964_v55 }
 0x304   : > { %v1635_v41 = vpop.f32.mrf.mxu0 }
 0x305   : > { %v1755_v63 = vrot.slane %v1739_v10, 7  ;;  %2876 = vmatmul.msk.f32.gmra.mxu3 %vm842_vm2, %v3543_v22  ;;  %v1702_v6 = vpop.f32.mrf.mxu1  ;;  %v1340_v22 = vadd.f32 %v3769_v58, %v3765_v57  ;;  %vm1525_vm6 = vcmp.gt.s32.totalorder %v1020_v62, 0 }
 0x306   : > { %2926 = vmatmul.msk.f32.gmra.mxu2 %vm670_vm1, %v3363_v8 }
 0x307   : > { %v1779_v13 = vsel %vm1767_vm3, %v1754_v44, %v1755_v63  ;;  %2893 = vmatmul.msk.f32.gmra.mxu0 %vm842_vm2, %v3598_v33  ;;  %v1508_v8 = vadd.f32 %v3874_v17, %v1340_v22 }
 0x308   : > { %v1820_v53 = vsel %vm1523_vm5, %v1779_v13, 0.0  ;;  %v1570_v54 = vpop.f32.mrf.mxu3 }
 0x309   : > { %v1636_v11 = vadd.f32 %v1635_v41, %v1570_v54  ;;  %v3956_v47 = vadd.f32 %v1820_v53, %v1507_v4  ;;  %v3979_v0 = vpop.f32.mrf.mxu2 }
 0x30b   : > { %v1740_v48 = vadd.f32 %v1702_v6, %v1636_v11  ;;  %v966_v6 = vadd.s32 64, %v3890_v56  ;;  %v1349_v11 = vadd.f32 %v3811_v59, %v3805_v49  ;;  %v1352_v59 = vadd.f32 %v3825_v14, %v3821_v43 }
 0x30c   : > { %v1638_v7 = vpop.f32.mrf.mxu0 }
 0x30d   : > { %v1756_v23 = vrot.slane %v1740_v48, 7  ;;  %2877 = vmatmul.msk.f32.gmra.mxu3 %vm842_vm2, %v3559_v26  ;;  %v1705_v39 = vpop.f32.mrf.mxu1  ;;  %v1343_v26 = vadd.f32 %v3783_v19, %v3779_v18  ;;  %v1034_v54 = vand.u32 15, %v966_v6  ;;  %v1512_v62 = vadd.f32 %v3945_v36, %v1352_v59  ;;  %v4464_v59 = vld [vmem:[#allocation24_spill] sm:$0xff] }
 0x30e   : > { %2927 = vmatmul.msk.f32.gmra.mxu2 %vm670_vm1, %v3383_v12 }
 0x30f   : > { %v1778_v44 = vsel %vm1767_vm3, %v1755_v63, %v1756_v23  ;;  %2894 = vmatmul.msk.f32.gmra.mxu0 %vm842_vm2, %v3608_v34  ;;  %v1509_v52 = vadd.f32 %v3882_v9, %v1343_v26  ;;  %vm1527_vm7 = vcmp.gt.s32.totalorder %v1034_v54, 0 }
 0x310   : > { %v3972_v57 = vadd.f32 %v1778_v44, %v1508_v8  ;;  %v1573_v58 = vpop.f32.mrf.mxu3 }
 0x311   : > { %v1639_v5 = vadd.f32 %v1638_v7, %v1573_v58  ;;  %v1511_v7 = vadd.f32 %v3925_v24, %v1349_v11  ;;  %v968_v24 = vadd.s32 80, %v3890_v56 }
 0x313   : > { %v1741_v15 = vadd.f32 %v1705_v39, %v1639_v5 }
 0x314   : > { %v1641_v45 = vpop.f32.mrf.mxu0 }
 0x315   : > { %v1757_v17 = vrot.slane %v1741_v15, 7  ;;  %2878 = vmatmul.msk.f32.gmra.mxu3 %vm842_vm2, %v3571_v28  ;;  %v1708_v51 = vpop.f32.mrf.mxu1  ;;  %v1346_v28 = vadd.f32 %v3797_v40, %v3793_v37 }
 0x316   : > { %2928 = vmatmul.msk.f32.gmra.mxu2 %vm670_vm1, %v3403_v16 }
 0x317   : > { %v1777_v12 = vsel %vm1767_vm3, %v1756_v23, %v1757_v17  ;;  %2895 = vmatmul.msk.f32.gmra.mxu0 %vm842_vm2, %v3618_v35  ;;  %v1510_v13 = vadd.f32 %v3902_v46, %v1346_v28 }
 0x318   : > { %v1822_v18 = vsel %vm1525_vm6, %v1777_v12, 0.0  ;;  %v1576_v19 = vpop.f32.mrf.mxu3 }
 0x319   : > { %v1642_v61 = vadd.f32 %v1641_v45, %v1576_v19  ;;  %v3987_v10 = vadd.f32 %v1822_v18, %v1509_v52  ;;  %v1048_v45 = vand.u32 15, %v968_v24 }
 0x31b   : > { %v1742_v9 = vadd.f32 %v1708_v51, %v1642_v61  ;;  %vm1529_vm8 = vcmp.gt.s32.totalorder %v1048_v45, 0 }
 0x31c   : > { %v1644_v41 = vpop.f32.mrf.mxu0 }
 0x31d   : > { %v1758_v63 = vrot.slane %v1742_v9, 7  ;;  %2879 = vmatmul.msk.f32.gmra.mxu3 %vm842_vm2, %v3583_v30  ;;  %v1711_v4 = vpop.f32.mrf.mxu1 }
 0x31f   : > { %v1776_v16 = vsel %vm1767_vm3, %v1757_v17, %v1758_v63  ;;  %2896 = vmatmul.msk.f32.gmra.mxu0 %vm842_vm2, %v3581_v29  ;;  %v1355_v17 = vadd.f32 %v3841_v2, %v3837_v20 }
 0x320   : > { %v3999_v53 = vadd.f32 %v1776_v16, %v1510_v13  ;;  %v1579_v37 = vpop.f32.mrf.mxu3 }
 0x321   : > { %v1645_v40 = vadd.f32 %v1644_v41, %v1579_v37  ;;  %v1513_v12 = vadd.f32 %v3960_v42, %v1355_v17 }
 0x323   : > { %v1743_v30 = vadd.f32 %v1711_v4, %v1645_v40  ;;  %v1885_v4 = vpop.f32.mrf.mxu2  ;;  %2929 = vmatmul.msk.f32.gmra.mxu2 %vm670_vm1, %v3323_v1  ;;  %v4462_v1 = vld [vmem:[#allocation18_spill] sm:$0xff] }
 0x324   : > { %v1647_v22 = vpop.f32.mrf.mxu0 }
 0x325   : > { %v1759_v48 = vrot.slane %v1743_v30, 7  ;;  %2880 = vmatmul.msk.f32.gmra.mxu3 %vm842_vm2, %v3598_v33  ;;  %v1714_v46 = vpop.f32.mrf.mxu1 }
 0x327   : > { %v1775_v23 = vsel %vm1767_vm3, %v1758_v63, %v1759_v48  ;;  %2897 = vmatmul.msk.f32.gmra.mxu0 %vm842_vm2, %v3596_v32 }
 0x328   : > { %v1824_v55 = vsel %vm1527_vm7, %v1775_v23, 0.0  ;;  %v1582_v39 = vpop.f32.mrf.mxu3 }
 0x329   : > { %v4010_v8 = vadd.f32 %v1824_v55, %v1511_v7  ;;  %v1648_v49 = vadd.f32 %v1647_v22, %v1582_v39  ;;  %v972_v39 = vadd.s32 112, %v3890_v56 }
 0x32b   : > { %v1744_v44 = vadd.f32 %v1714_v46, %v1648_v49  ;;  %v1888_v22 = vpop.f32.mrf.mxu2  ;;  %2930 = vmatmul.msk.f32.gmra.mxu2 %vm670_vm1, %v4462_v1  ;;  %v4475_v1 = vld [vmem:[#allocation17_spill] sm:$0xff] }
 0x32c   : > { %v1650_v58 = vpop.f32.mrf.mxu0 }
 0x32d   : > { %v1760_v33 = vrot.slane %v1744_v44, 7  ;;  %2881 = vmatmul.msk.f32.gmra.mxu3 %vm842_vm2, %v3608_v34  ;;  %v1717_v5 = vpop.f32.mrf.mxu1  ;;  %v4465_v44 = vld [vmem:[#allocation30_spill] sm:$0xff] }
 0x32f   : > { %v1774_v26 = vsel %vm1767_vm3, %v1759_v48, %v1760_v33  ;;  %2898 = vmatmul.msk.f32.gmra.mxu0 %vm842_vm2, %v3513_v60  ;;  %v4463_v48 = vld [vmem:[#allocation29_spill] sm:$0xff] }
 0x330   : > { %v4022_v15 = vadd.f32 %v1774_v26, %v1512_v62  ;;  %v1585_v14 = vpop.f32.mrf.mxu3  ;;  %v1076_v26 = vand.u32 15, %v972_v39  ;;  %v4476_v39 = vld [vmem:[#allocation19_spill] sm:$0xff] }
 0x331   : > { %v1651_v43 = vadd.f32 %v1650_v58, %v1585_v14 }
 0x332   : > { %vm1533_vm10 = vcmp.gt.s32.totalorder %v1076_v26, 0  ;;  %v4114_v26 = vld [vmem:[%s4395_s8] ss:$0 sm:$0xff] }
 0x333   : > { %v1745_v34 = vadd.f32 %v1717_v5, %v1651_v43  ;;  %v1891_v24 = vpop.f32.mrf.mxu2  ;;  %v4466_v5 = vld [vmem:[#allocation20_spill] sm:$0xff] }
 0x334   : > { %v1653_v51 = vpop.f32.mrf.mxu0  ;;  %2931 = vmatmul.msk.f32.gmra.mxu2 %vm670_vm1, %v4466_v5  ;;  %v959_v5 = vadd.s32 8, %v3890_v56 }
 0x335   : > { %v1761_v52 = vrot.slane %v1745_v34, 7  ;;  %2882 = vmatmul.msk.f32.gmra.mxu3 %vm842_vm2, %v3618_v35  ;;  %v1720_v36 = vpop.f32.mrf.mxu1  ;;  %v970_v35 = vadd.s32 96, %v3890_v56  ;;  %v4467_v34 = vld [vmem:[#allocation25_spill] sm:$0xff] }
 0x337   : > { %v1773_v18 = vsel %vm1767_vm3, %v1760_v33, %v1761_v52  ;;  %2899 = vmatmul.msk.f32.gmra.mxu0 %vm842_vm2, %v3541_v21  ;;  %v1062_v16 = vand.u32 15, %v970_v35 }
 0x338   : > { %v1826_v19 = vsel %vm1529_vm8, %v1773_v18, 0.0  ;;  %v1588_v61 = vpop.f32.mrf.mxu3  ;;  %v4469_v18 = vld [vmem:[#allocation31_spill] sm:$0xff] }
 0x339   : > { %v4033_v28 = vadd.f32 %v1826_v19, %v1513_v12  ;;  %v1654_v2 = vadd.f32 %v1653_v51, %v1588_v61  ;;  %vm1531_vm9 = vcmp.gt.s32.totalorder %v1062_v16, 0  ;;  %v4468_v12 = vld [vmem:[#allocation22_spill] sm:$0xff] }
 0x33b   : > { %v1746_v20 = vadd.f32 %v1720_v36, %v1654_v2  ;;  %v1894_v36 = vpop.f32.mrf.mxu2  ;;  %v978_v2 = vand.u32 15, %v3890_v56 }
 0x33c   : > { %v1656_v9 = vpop.f32.mrf.mxu0  ;;  %2932 = vmatmul.msk.f32.gmra.mxu2 %vm670_vm1, %v4468_v12 }
 0x33d   : > { %v1762_v41 = vrot.slane %v1746_v20, 7  ;;  %2883 = vmatmul.msk.f32.gmra.mxu3 %vm842_vm2, %v3581_v29  ;;  %v1723_v42 = vpop.f32.mrf.mxu1  ;;  %v4471_v20 = vld [vmem:[#allocation27_spill] sm:$0xff]  ;;  %vm1519_vm11 = vcmp.gt.s32.totalorder %v978_v2, 0 }
 0x33f   : > { %v4040_v63 = vsel %vm1767_vm3, %v1761_v52, %v1762_v41  ;;  %2900 = vmatmul.msk.f32.gmra.mxu0 %vm842_vm2, %v3557_v25 }
 0x340   : > { %v1591_v6 = vpop.f32.mrf.mxu3 }
 0x341   : > { %v1657_v13 = vadd.f32 %v1656_v9, %v1591_v6  ;;  %v4472_v6 = vld [vmem:[#allocation28_spill] sm:$0xff] }
 0x343   : > { %v1747_v37 = vadd.f32 %v1723_v42, %v1657_v13 }
 0x344   : > { %v1659_v40 = vpop.f32.mrf.mxu0 }
 0x345   : > { %v1763_v29 = vrot.slane %v1747_v37, 7  ;;  %2884 = vmatmul.msk.f32.gmra.mxu3 %vm842_vm2, %v3596_v32  ;;  %v1726_v54 = vpop.f32.mrf.mxu1  ;;  %v4473_v37 = vrot.slane %v3892_v3, 7 }
 0x347   : > { %v1771_v11 = vsel %vm1767_vm3, %v1762_v41, %v1763_v29  ;;  %2901 = vmatmul.msk.f32.gmra.mxu0 %vm842_vm2, %v3569_v27 }
 0x348   : > { %v1828_v25 = vsel %vm1531_vm9, %v1771_v11, 0.0  ;;  %v1594_v30 = vpop.f32.mrf.mxu3 }
 0x349   : > { %v4055_v46 = vadd.f32 %v1828_v25, %v4463_v48  ;;  %v1660_v7 = vadd.f32 %v1659_v40, %v1594_v30  ;;  %v1897_v30 = vpop.f32.mrf.mxu2  ;;  %2933 = vmatmul.msk.f32.gmra.mxu2 %vm670_vm1, %v4475_v1 }
 0x34b   : > { %v1748_v23 = vadd.f32 %v1726_v54, %v1660_v7  ;;  %v4474_v54 = vld [vmem:[#allocation34_spill] sm:$0xff] }
 0x34c   : > { %v1662_v55 = vpop.f32.mrf.mxu0 }
 0x34d   : > { %v1764_v32 = vrot.slane %v1748_v23, 7  ;;  %2885 = vmatmul.msk.f32.gmra.mxu3 %vm842_vm2, %v3513_v60  ;;  %v1729_v49 = vpop.f32.mrf.mxu1 }
 0x34f   : > { %v1770_v27 = vsel %vm1767_vm3, %v1763_v29, %v1764_v32  ;;  %2902 = vmatmul.msk.f32.gmra.mxu0 %vm842_vm2, %v4464_v59 }
 0x350   : > { %v4065_v58 = vadd.f32 %v1770_v27, %v4465_v44  ;;  %v1597_v33 = vpop.f32.mrf.mxu3 }
 0x351   : > { %v1663_v62 = vadd.f32 %v1662_v55, %v1597_v33 }
 0x353   : > { %v1749_v60 = vadd.f32 %v1729_v49, %v1663_v62 }
 0x354   : > { %v1665_v14 = vpop.f32.mrf.mxu0 }
 0x355   : > { %v1765_v43 = vrot.slane %v1749_v60, 7  ;;  %2886 = vmatmul.msk.f32.gmra.mxu3 %vm842_vm2, %v3541_v21  ;;  %v1732_v17 = vpop.f32.mrf.mxu1  ;;  %v4470_v21 = vld [vmem:[#allocation26_spill] sm:$0xff] }
 0x356   : > { %v1325_v9 = vadd.f32 %v4471_v20, %v4470_v21 }
 0x357   : > { %v1769_v45 = vsel %vm1767_vm3, %v1764_v32, %v1765_v43  ;;  %2903 = vmatmul.msk.f32.gmra.mxu0 %vm842_vm2, %v4467_v34  ;;  %v1900_v32 = vpop.f32.mrf.mxu2  ;;  %2934 = vmatmul.msk.f32.gmra.mxu2 %vm670_vm1, %v4476_v39 }
 0x358   : > { %v1830_v51 = vsel %vm1533_vm10, %v1769_v45, 0.0  ;;  %v1600_v52 = vpop.f32.mrf.mxu3  ;;  %v1503_v13 = vadd.f32 %v4472_v6, %v1325_v9 }
 0x359   : > { %v4078_v19 = vadd.f32 %v1830_v51, %v4469_v18  ;;  %v1666_v61 = vadd.f32 %v1665_v14, %v1600_v52 }
 0x35b   : > { %v1750_v41 = vadd.f32 %v1732_v17, %v1666_v61  ;;  %v985_v17 = vand.u32 15, %v959_v5 }
 0x35c   : > { %v2017_v35 = vpop.f32.mrf.mxu0 }
 0x35d   : > { %v1766_v42 = vrot.slane %v1750_v41, 7  ;;  %vm1849_vm13 = vcmp.lt.s32.totalorder %v985_v17, 15  ;;  %v4478_v41 = vld [vmem:[#allocation23_spill] sm:$0xff]  ;;  %v963_v17 = vadd.s32 40, %v3890_v56 }
 0x35f   : > { %v1768_v16 = vsel %vm1767_vm3, %v1765_v43, %v1766_v42  ;;  %v1783_v40 = vsel %vm1767_vm3, %v1766_v42, %v4473_v37  ;;  %v1903_v14 = vpop.f32.mrf.mxu2  ;;  %v4477_v43 = vld [vmem:[#allocation21_spill] sm:$0xff] }
 0x360   : > { %v1816_v29 = vsel %vm1519_vm11, %v1783_v40, 0.0  ;;  %v4091_v11 = vadd.f32 %v1768_v16, %v4474_v54  ;;  %v1950_v25 = vpop.f32.mrf.mxu3  ;;  %2935 = vmatmul.msk.f32.gmra.mxu2 %vm670_vm1, %v4477_v43  ;;  %v961_v40 = vadd.s32 24, %v3890_v56 }
 0x361   : > { %v1832_v48 = vadd.f32 %v1816_v29, %v1503_v13  ;;  %v1951_v23 = vadd.f32 %v1950_v25, %v1885_v4  ;;  %v4105_v4 = vld [vmem:[%s4394_s7] ss:$0 sm:$0xff] }
 0x363   : > { %v4097_v3 = vadd.f32 %v2017_v35, %v1951_v23 }
 0x364   : > { %v2020_v7 = vpop.f32.mrf.mxu0 }
 0x365   : > { %v2081_v44 = vrot.slane %v4097_v3, 1 }
 0x367   : > { %v1906_v9 = vpop.f32.mrf.mxu2 }
 0x368   : > { %v1953_v55 = vpop.f32.mrf.mxu3  ;;  %2936 = vmatmul.msk.f32.gmra.mxu2 %vm670_vm1, %v4478_v41 }
 0x369   : > { %v1954_v49 = vadd.f32 %v1953_v55, %v1888_v22 }
 0x36b   : > { %v2066_v27 = vadd.f32 %v2020_v7, %v1954_v49 }
 0x36c   : > { %v2023_v59 = vpop.f32.mrf.mxu0 }
 0x36d   : > { %v2082_v33 = vrot.slane %v2066_v27, 1 }
 0x36f   : > { %v2112_v62 = vsel %vm2097_vm12, %v2081_v44, %v2082_v33 }
 0x370   : > { %v2162_v22 = vadd.f32 %v2112_v62, %v1832_v48  ;;  %v1956_v60 = vpop.f32.mrf.mxu3 }
 0x371   : > { %v1957_v45 = vadd.f32 %v1956_v60, %v1891_v24 }
 0x372   : > { %v2182_v34 = vmul.f32 %v4105_v4, %v2162_v22 }
 0x373   : > { %v2067_v51 = vadd.f32 %v2023_v59, %v1957_v45  ;;  %v1909_v59 = vpop.f32.mrf.mxu2 }
 0x374   : > { %v2202_v52 = vadd.f32 %v4114_v26, %v2182_v34  ;;  %v2026_v12 = vpop.f32.mrf.mxu0 }
 0x375   : > { %v2083_v18 = vrot.slane %v2067_v51, 1 }
 0x376   : > { %v2218_v61 = vmax.f32 %v2202_v52, 0.0 }
 0x377   : > { %v2111_v2 = vsel %vm2097_vm12, %v2082_v33, %v2083_v18 }
 0x378   : > { %v2147_v21 = vsel %vm1849_vm13, %v2111_v2, 0.0  ;;  %v1959_v20 = vpop.f32.mrf.mxu3  ;;  %2904 = vmatmul.msk.f32.vlgmr.msra.gmra.mxu1 %vm842_vm2, %v2218_v61 }
 0x379   : > { %v2163_v24 = vadd.f32 %v2147_v21, %v3912_v38  ;;  %v1960_v35 = vadd.f32 %v1959_v20, %v1894_v36  ;;  %v999_v38 = vand.u32 15, %v961_v40 }
 0x37b   : > { %v2068_v42 = vadd.f32 %v2026_v12, %v1960_v35  ;;  %v2183_v6 = vmul.f32 %v4105_v4, %v2163_v24  ;;  %vm1851_vm14 = vcmp.lt.s32.totalorder %v999_v38, 15 }
 0x37c   : > { %v2029_v13 = vpop.f32.mrf.mxu0 }
 0x37d   : > { %v2084_v16 = vrot.slane %v2068_v42, 1  ;;  %v2203_v37 = vadd.f32 %v4114_v26, %v2183_v6 }
 0x37f   : > { %v2110_v29 = vsel %vm2097_vm12, %v2083_v18, %v2084_v16  ;;  %v2219_v54 = vmax.f32 %v2203_v37, 0.0  ;;  %v1912_v18 = vpop.f32.mrf.mxu2 }
 0x380   : > { %v2164_v25 = vadd.f32 %v2110_v29, %v3927_v31  ;;  %v1962_v1 = vpop.f32.mrf.mxu3 }
 0x381   : > { %v1963_v48 = vadd.f32 %v1962_v1, %v1897_v30  ;;  %2905 = vmatmul.msk.f32.gmra.mxu1 %vm842_vm2, %v2219_v54 }
 0x382   : > { %v2184_v36 = vmul.f32 %v4105_v4, %v2164_v25  ;;  %v965_v25 = vadd.s32 56, %v3890_v56 }
 0x383   : > { %v2069_v7 = vadd.f32 %v2029_v13, %v1963_v48 }
 0x384   : > { %v2204_v23 = vadd.f32 %v4114_v26, %v2184_v36  ;;  %v2032_v55 = vpop.f32.mrf.mxu0  ;;  %v1027_v36 = vand.u32 15, %v965_v25 }
 0x385   : > { %v2085_v39 = vrot.slane %v2069_v7, 1 }
 0x386   : > { %v2220_v49 = vmax.f32 %v2204_v23, 0.0  ;;  %vm1855_vm0 = vcmp.lt.s32.totalorder %v1027_v36, 15 }
 0x387   : > { %v2109_v27 = vsel %vm2097_vm12, %v2084_v16, %v2085_v39  ;;  %v1915_v37 = vpop.f32.mrf.mxu2 }
 0x388   : > { %v2149_v33 = vsel %vm1851_vm14, %v2109_v27, 0.0  ;;  %v1965_v31 = vpop.f32.mrf.mxu3 }
 0x389   : > { %v2165_v30 = vadd.f32 %v2149_v33, %v3941_v50  ;;  %v1966_v5 = vadd.f32 %v1965_v31, %v1900_v32  ;;  %2906 = vmatmul.msk.f32.gmra.mxu1 %vm842_vm2, %v2220_v49  ;;  %v1013_v32 = vand.u32 15, %v963_v17  ;;  %v967_v17 = vadd.s32 72, %v3890_v56 }
 0x38b   : > { %v2070_v62 = vadd.f32 %v2032_v55, %v1966_v5  ;;  %v2185_v22 = vmul.f32 %v4105_v4, %v2165_v30  ;;  %vm1853_vm15 = vcmp.lt.s32.totalorder %v1013_v32, 15  ;;  %v1041_v32 = vand.u32 15, %v967_v17 }
 0x38c   : > { %v2035_v60 = vpop.f32.mrf.mxu0 }
 0x38d   : > { %v2086_v43 = vrot.slane %v2070_v62, 1  ;;  %v2205_v45 = vadd.f32 %v4114_v26, %v2185_v22  ;;  %vm1857_vm1 = vcmp.lt.s32.totalorder %v1041_v32, 15 }
 0x38f   : > { %v2108_v34 = vsel %vm2097_vm12, %v2085_v39, %v2086_v43  ;;  %v2221_v51 = vmax.f32 %v2205_v45, 0.0  ;;  %v1918_v27 = vpop.f32.mrf.mxu2 }
 0x390   : > { %v2166_v52 = vadd.f32 %v2108_v34, %v3956_v47  ;;  %v1968_v12 = vpop.f32.mrf.mxu3 }
 0x391   : > { %v1969_v50 = vadd.f32 %v1968_v12, %v1903_v14  ;;  %2907 = vmatmul.msk.f32.gmra.mxu1 %vm842_vm2, %v2221_v51 }
 0x392   : > { %v2186_v61 = vmul.f32 %v4105_v4, %v2166_v52 }
 0x393   : > { %v2071_v2 = vadd.f32 %v2035_v60, %v1969_v50 }
 0x394   : > { %v2206_v21 = vadd.f32 %v4114_v26, %v2186_v61  ;;  %v2038_v20 = vpop.f32.mrf.mxu0 }
 0x395   : > { %v2087_v41 = vrot.slane %v2071_v2, 1 }
 0x396   : > { %v2222_v24 = vmax.f32 %v2206_v21, 0.0 }
 0x397   : > { %v2107_v35 = vsel %vm2097_vm12, %v2086_v43, %v2087_v41  ;;  %v1921_v52 = vpop.f32.mrf.mxu2 }
 0x398   : > { %v2151_v42 = vsel %vm1853_vm15, %v2107_v35, 0.0  ;;  %v1971_v47 = vpop.f32.mrf.mxu3 }
 0x399   : > { %v2167_v14 = vadd.f32 %v2151_v42, %v3972_v57  ;;  %v1972_v6 = vadd.f32 %v1971_v47, %v1906_v9  ;;  %2908 = vmatmul.msk.f32.gmra.mxu1 %vm842_vm2, %v2222_v24 }
 0x39b   : > { %v2072_v13 = vadd.f32 %v2038_v20, %v1972_v6  ;;  %v2187_v16 = vmul.f32 %v4105_v4, %v2167_v14 }
 0x39c   : > { %v2041_v40 = vpop.f32.mrf.mxu0 }
 0x39d   : > { %v2088_v29 = vrot.slane %v2072_v13, 1  ;;  %v2207_v54 = vadd.f32 %v4114_v26, %v2187_v16 }
 0x39f   : > { %v2106_v1 = vsel %vm2097_vm12, %v2087_v41, %v2088_v29  ;;  %v2223_v48 = vmax.f32 %v2207_v54, 0.0  ;;  %v1924_v14 = vpop.f32.mrf.mxu2 }
 0x3a0   : > { %v2168_v38 = vadd.f32 %v2106_v1, %v3987_v10  ;;  %v1974_v57 = vpop.f32.mrf.mxu3 }
 0x3a1   : > { %v1975_v9 = vadd.f32 %v1974_v57, %v1909_v59  ;;  %2909 = vmatmul.msk.f32.gmra.mxu1 %vm842_vm2, %v2223_v48  ;;  %v4479_v48 = vld [vmem:[#allocation32_spill] sm:$0xff] }
 0x3a2   : > { %v2188_v7 = vmul.f32 %v4105_v4, %v2168_v38  ;;  %v4480_v38 = vld [vmem:[#allocation33_spill] sm:$0xff] }
 0x3a3   : > { %v2073_v23 = vadd.f32 %v2041_v40, %v1975_v9  ;;  %v1358_v57 = vadd.f32 %v4480_v38, %v4479_v48 }
 0x3a4   : > { %v2208_v55 = vadd.f32 %v4114_v26, %v2188_v7  ;;  %v2044_v39 = vpop.f32.mrf.mxu0 }
 0x3a5   : > { %v2089_v49 = vrot.slane %v2073_v23, 1 }
 0x3a6   : > { %v2224_v33 = vmax.f32 %v2208_v55, 0.0 }
 0x3a7   : > { %v2105_v31 = vsel %vm2097_vm12, %v2088_v29, %v2089_v49  ;;  %v969_v29 = vadd.s32 88, %v3890_v56  ;;  %v1927_v55 = vpop.f32.mrf.mxu2 }
 0x3a8   : > { %v2153_v30 = vsel %vm1855_vm0, %v2105_v31, 0.0  ;;  %v1977_v10 = vpop.f32.mrf.mxu3 }
 0x3a9   : > { %v2169_v59 = vadd.f32 %v2153_v30, %v3999_v53  ;;  %v1978_v5 = vadd.f32 %v1977_v10, %v1912_v18  ;;  %2910 = vmatmul.msk.f32.gmra.mxu1 %vm842_vm2, %v2224_v33  ;;  %v1055_v36 = vand.u32 15, %v969_v29 }
 0x3ab   : > { %v2074_v62 = vadd.f32 %v2044_v39, %v1978_v5  ;;  %v2189_v22 = vmul.f32 %v4105_v4, %v2169_v59  ;;  %vm1859_vm3 = vcmp.lt.s32.totalorder %v1055_v36, 15 }
 0x3ac   : > { %v2047_v60 = vpop.f32.mrf.mxu0 }
 0x3ad   : > { %v2090_v43 = vrot.slane %v2074_v62, 1  ;;  %v2209_v45 = vadd.f32 %v4114_v26, %v2189_v22 }
 0x3af   : > { %v2104_v34 = vsel %vm2097_vm12, %v2089_v49, %v2090_v43  ;;  %v2225_v51 = vmax.f32 %v2209_v45, 0.0  ;;  %v971_v45 = vadd.s32 104, %v3890_v56  ;;  %v1930_v17 = vpop.f32.mrf.mxu2 }
 0x3b0   : > { %v2170_v12 = vadd.f32 %v2104_v34, %v4010_v8  ;;  %v1980_v53 = vpop.f32.mrf.mxu3 }
 0x3b1   : > { %v1981_v50 = vadd.f32 %v1980_v53, %v1915_v37  ;;  %2911 = vmatmul.msk.f32.gmra.mxu1 %vm842_vm2, %v2225_v51 }
 0x3b2   : > { %v2190_v18 = vmul.f32 %v4105_v4, %v2170_v12 }
 0x3b3   : > { %v2075_v61 = vadd.f32 %v2047_v60, %v1981_v50  ;;  %v1069_v50 = vand.u32 15, %v971_v45 }
 0x3b4   : > { %v2210_v2 = vadd.f32 %v4114_v26, %v2190_v18  ;;  %v2050_v21 = vpop.f32.mrf.mxu0 }
 0x3b5   : > { %v2091_v20 = vrot.slane %v2075_v61, 1  ;;  %vm1861_vm4 = vcmp.lt.s32.totalorder %v1069_v50, 15 }
 0x3b6   : > { %v2226_v41 = vmax.f32 %v2210_v2, 0.0 }
 0x3b7   : > { %v2103_v24 = vsel %vm2097_vm12, %v2090_v43, %v2091_v20 }
 0x3b8   : > { %v2155_v35 = vsel %vm1857_vm1, %v2103_v24, 0.0  ;;  %v1983_v42 = vpop.f32.mrf.mxu3 }
 0x3b9   : > { %v2171_v8 = vadd.f32 %v2155_v35, %v4022_v15  ;;  %v1984_v47 = vadd.f32 %v1983_v42, %v1918_v27  ;;  %2912 = vmatmul.msk.f32.gmra.mxu1 %vm842_vm2, %v2226_v41  ;;  %v1514_v27 = vadd.f32 %v3979_v0, %v1358_v57 }
 0x3bb   : > { %v2076_v6 = vadd.f32 %v2050_v21, %v1984_v47  ;;  %v2191_v13 = vmul.f32 %v4105_v4, %v2171_v8  ;;  %v1843_v31 = vadd.f32 %v4040_v63, %v1514_v27  ;;  %v973_v21 = vadd.s32 120, %v3890_v56 }
 0x3bc   : > { %v2053_v16 = vpop.f32.mrf.mxu0 }
 0x3bd   : > { %v2092_v37 = vrot.slane %v2076_v6, 1  ;;  %v2211_v40 = vadd.f32 %v4114_v26, %v2191_v13 }
 0x3bf   : > { %v2102_v54 = vsel %vm2097_vm12, %v2091_v20, %v2092_v37  ;;  %v2227_v25 = vmax.f32 %v2211_v40, 0.0  ;;  %v2409_v20 = vpop.f32.mrf.mxu2 }
 0x3c0   : > { %v2172_v1 = vadd.f32 %v2102_v54, %v4033_v28  ;;  %v1986_v15 = vpop.f32.mrf.mxu3 }
 0x3c1   : > { %v1987_v9 = vadd.f32 %v1986_v15, %v1921_v52  ;;  %2913 = vmatmul.msk.f32.gmra.mxu1 %vm842_vm2, %v2227_v25 }
 0x3c2   : > { %v2192_v7 = vmul.f32 %v4105_v4, %v2172_v1 }
 0x3c3   : > { %v2077_v23 = vadd.f32 %v2053_v16, %v1987_v9 }
 0x3c4   : > { %v2212_v39 = vadd.f32 %v4114_v26, %v2192_v7  ;;  %v2056_v49 = vpop.f32.mrf.mxu0  ;;  %v4244_v7 = vld [vmem:[%s4481_s28] ss:$0 sm:$0xff]  ;;  %s3052_s28 = sshra.s32 %s2565_s20, 4  ;;  %s3053_s28 = int_to_ptr.hbm [resolvable:$true] %s3052_s28 }
 0x3c5   : > { %v2093_v33 = vrot.slane %v2077_v23, 1  ;;  %s3054_s29 = scalar_lea.hbm %s3053_s28, 128  ;;  %p3059_p12 = scmp.lt.s32.totalorder %s3053_s28, %s4484_s15 }
 0x3c6   : > { %v2228_v28 = vmax.f32 %v2212_v39, 0.0  ;;  %p3055_p9 = scmp.ne.s32.totalorder %s3053_s28, %s3054_s29  ;;  %p3060_p13 = scmp.lt.s32.totalorder %s3058_s18, %s3054_s29 }
 0x3c7   : > { %v2101_v30 = vsel %vm2097_vm12, %v2092_v37, %v2093_v33  ;;  %v2412_v40 = vpop.f32.mrf.mxu2 }
 0x3c8   : > { %v2157_v10 = vsel %vm1859_vm3, %v2101_v30, 0.0  ;;  %v1989_v59 = vpop.f32.mrf.mxu3  ;;  %p3056_p10 = pnand %p3055_p9, %p3269_p3  ;;  %p3061_p0 = por %p3060_p13, %p3059_p12 }
 0x3c9   : > { %v2173_v5 = vadd.f32 %v2157_v10, %v1843_v31  ;;  %v1990_v62 = vadd.f32 %v1989_v59, %v1924_v14  ;;  %2914 = vmatmul.msk.f32.gmra.mxu1 %vm842_vm2, %v2228_v28  ;;  %v1083_v14 = vand.u32 15, %v973_v21 }
 0x3ca   : > { %p3057_p11 = pneg %p3056_p10 }
 0x3cb   : > { %v2078_v22 = vadd.f32 %v2056_v49, %v1990_v62  ;;  %v2193_v60 = vmul.f32 %v4105_v4, %v2173_v5  ;;  %vm1863_vm5 = vcmp.lt.s32.totalorder %v1083_v14, 15 }
 0x3cc   : > { %v2059_v34 = vpop.f32.mrf.mxu0  ;;  %p3062_p1 = pnand %p3061_p0, %p3057_p11 }
 0x3cd   : > { %v2094_v43 = vrot.slane %v2078_v22, 1  ;;  %v2213_v0 = vadd.f32 %v4114_v26, %v2193_v60 }
 0x3cf   : > { %v2100_v63 = vsel %vm2097_vm12, %v2093_v33, %v2094_v43  ;;  %v2229_v51 = vmax.f32 %v2213_v0, 0.0  ;;  %v2415_v9 = vpop.f32.mrf.mxu2 }
 0x3d0   : > { %v2174_v52 = vadd.f32 %v2100_v63, %v4055_v46  ;;  %v1992_v12 = vpop.f32.mrf.mxu3 }
 0x3d1   : > { %v1993_v53 = vadd.f32 %v1992_v12, %v1927_v55  ;;  %2915 = vmatmul.msk.f32.gmra.mxu1 %vm842_vm2, %v2229_v51 }
 0x3d2   : > { %v2194_v32 = vmul.f32 %v4105_v4, %v2174_v52 }
 0x3d3   : > { %v2079_v18 = vadd.f32 %v2059_v34, %v1993_v53 }
 0x3d4   : > { %v2214_v61 = vadd.f32 %v4114_v26, %v2194_v32  ;;  %v2062_v42 = vpop.f32.mrf.mxu0 }
 0x3d5   : > { %v2095_v2 = vrot.slane %v2079_v18, 1 }
 0x3d6   : > { %v2230_v41 = vmax.f32 %v2214_v61, 0.0 }
 0x3d7   : > { %v2099_v24 = vsel %vm2097_vm12, %v2094_v43, %v2095_v2 }
 0x3d8   : > { %v2159_v46 = vsel %vm1861_vm4, %v2099_v24, 0.0  ;;  %v1995_v35 = vpop.f32.mrf.mxu3 }
 0x3d9   : > { %v2175_v8 = vadd.f32 %v2159_v46, %v4065_v58  ;;  %v1996_v47 = vadd.f32 %v1995_v35, %v1930_v17  ;;  %2916 = vmatmul.msk.f32.gmra.mxu1 %vm842_vm2, %v2230_v41 }
 0x3db   : > { %v2080_v6 = vadd.f32 %v2062_v42, %v1996_v47  ;;  %v2195_v13 = vmul.f32 %v4105_v4, %v2175_v8 }
 0x3dd   : > { %v2096_v16 = vrot.slane %v2080_v6, 1  ;;  %v2215_v37 = vadd.f32 %v4114_v26, %v2195_v13 }
 0x3df   : > { %v2098_v29 = vsel %vm2097_vm12, %v2095_v2, %v2096_v16  ;;  %v2113_v58 = vsel %vm2097_vm12, %v2096_v16, %v2081_v44  ;;  %v2231_v54 = vmax.f32 %v2215_v37, 0.0  ;;  %v2418_v44 = vpop.f32.mrf.mxu2 }
 0x3e0   : > { %v2161_v25 = vsel %vm1863_vm5, %v2113_v58, 0.0  ;;  %v2176_v1 = vadd.f32 %v2098_v29, %v4078_v19  ;;  %v4227_v19 = vld [vmem:[%s4400_s13] ss:$0 sm:$0xff] }
 0x3e1   : > { %2917 = vmatmul.msk.f32.gmra.mxu1 %vm842_vm2, %v2231_v54  ;;  %v2177_v48 = vadd.f32 %v2161_v25, %v4091_v11  ;;  %v4233_v11 = vld [vmem:[%s4397_s10] ss:$0 sm:$0xff]  ;;  %v2462_v28 = vmul.f32 %v4227_v19, %v2412_v40  ;;  %v2463_v22 = vmul.f32 %v4227_v19, %v2415_v9  ;;  %v2464_v51 = vmul.f32 %v4227_v19, %v2418_v44 }
 0x3e2   : > { %v2196_v15 = vmul.f32 %v4105_v4, %v2176_v1 }
 0x3e3   : > { %v2197_v36 = vmul.f32 %v4105_v4, %v2177_v48  ;;  %v2461_v4 = vmul.f32 %v4227_v19, %v2409_v20 }
 0x3e4   : > { %v2216_v38 = vadd.f32 %v4114_v26, %v2196_v15 }
 0x3e5   : > { %v2217_v56 = vadd.f32 %v4114_v26, %v2197_v36  ;;  %v4239_v26 = vld [vmem:[%s4401_s14] ss:$0 sm:$0xff] }
 0x3e6   : > { %v2232_v57 = vmax.f32 %v2216_v38, 0.0  ;;  %v2481_v39 = vadd.f32 %v4239_v26, %v2461_v4  ;;  %v2482_v59 = vadd.f32 %v4239_v26, %v2462_v28  ;;  %v2483_v17 = vadd.f32 %v4239_v26, %v2463_v22 }
 0x3e7   : > { %v2233_v3 = vmax.f32 %v2217_v56, 0.0  ;;  %v2421_v33 = vpop.f32.mrf.mxu2  ;;  %v2484_v32 = vadd.f32 %v4239_v26, %v2464_v51 }
 0x3e8   : > { %v2465_v2 = vmul.f32 %v4227_v19, %v2421_v33 }
 0x3e9   : > { %2918 = vmatmul.msk.f32.gmra.mxu1 %vm842_vm2, %v2232_v57 }
 0x3ea   : > { %v2485_v24 = vadd.f32 %v4239_v26, %v2465_v2 }
 0x3ef   : > { %v2424_v60 = vpop.f32.mrf.mxu2 }
 0x3f0   : > { %v2466_v8 = vmul.f32 %v4227_v19, %v2424_v60 }
 0x3f1   : > { %2919 = vmatmul.msk.f32.gmra.mxu1 %vm842_vm2, %v2233_v3  ;;  %vm2529_vm2 = vcmask 130048  }
 0x3f2   : > { %v2486_v13 = vadd.f32 %v4239_v26, %v2466_v8 }
 0x3f5   : > { %v2300_v23 = vpop.f32.mrf.mxu1 }
 0x3f6   : > { %v2352_v55 = vmul.f32 %v4233_v11, %v2300_v23 }
 0x3f7   : > { %v2427_v53 = vpop.f32.mrf.mxu2 }
 0x3f8   : > { %v2372_v49 = vadd.f32 %v4244_v7, %v2352_v55  ;;  %v2467_v29 = vmul.f32 %v4227_v19, %v2427_v53 }
 0x3fa   : > { %v2497_v27 = vadd.f32 %v2481_v39, %v2372_v49  ;;  %v2487_v1 = vadd.f32 %v4239_v26, %v2467_v29 }
 0x3fc   : > { %v2513_v31 = vmax.f32 %v2497_v27, 0.0 }
 0x3fe   : > { %2530 = vst.msk [vmem:[%s3472_s26] sm:$0xff] %vm2529_vm2, %v2513_v31  ;;  %v2303_v30 = vpop.f32.mrf.mxu1 }
 0x3ff   : > { %v2353_v10 = vmul.f32 %v4233_v11, %v2303_v30  ;;  %v2430_v46 = vpop.f32.mrf.mxu2 }
 0x400   : > { %v2468_v38 = vmul.f32 %v4227_v19, %v2430_v46 }
 0x401   : > { %v2373_v5 = vadd.f32 %v4244_v7, %v2353_v10 }
 0x402   : > { %v2488_v3 = vadd.f32 %v4239_v26, %v2468_v38 }
 0x403   : > { %v2498_v62 = vadd.f32 %v2482_v59, %v2373_v5 }
 0x405   : > { %v2514_v43 = vmax.f32 %v2498_v62, 0.0 }
 0x406   : > { %v2306_v0 = vpop.f32.mrf.mxu1 }
 0x407   : > { %2531 = vst.msk [vmem:[%s3472_s26 + $0x8] sm:$0xff] %vm2529_vm2, %v2514_v43  ;;  %v2354_v45 = vmul.f32 %v4233_v11, %v2306_v0  ;;  %v2433_v37 = vpop.f32.mrf.mxu2 }
 0x408   : > { %v2469_v23 = vmul.f32 %v4227_v19, %v2433_v37 }
 0x409   : > { %v2374_v34 = vadd.f32 %v4244_v7, %v2354_v45 }
 0x40a   : > { %v2489_v33 = vadd.f32 %v4239_v26, %v2469_v23 }
 0x40b   : > { %v2499_v63 = vadd.f32 %v2483_v17, %v2374_v34 }
 0x40d   : > { %v2515_v52 = vmax.f32 %v2499_v63, 0.0 }
 0x40e   : > { %v2309_v12 = vpop.f32.mrf.mxu1 }
 0x40f   : > { %2532 = vst.msk [vmem:[%s3472_s26 + $0x10] sm:$0xff] %vm2529_vm2, %v2515_v52  ;;  %v2355_v50 = vmul.f32 %v4233_v11, %v2309_v12  ;;  %v2436_v57 = vpop.f32.mrf.mxu2 }
 0x410   : > { %v2470_v30 = vmul.f32 %v4227_v19, %v2436_v57 }
 0x411   : > { %v2375_v18 = vadd.f32 %v4244_v7, %v2355_v50 }
 0x412   : > { %v2490_v62 = vadd.f32 %v4239_v26, %v2470_v30 }
 0x413   : > { %v2500_v61 = vadd.f32 %v2484_v32, %v2375_v18 }
 0x415   : > { %v2516_v21 = vmax.f32 %v2500_v61, 0.0 }
 0x416   : > { %v2312_v20 = vpop.f32.mrf.mxu1 }
 0x417   : > { %2533 = vst.msk [vmem:[%s3472_s26 + $0x18] sm:$0xff] %vm2529_vm2, %v2516_v21  ;;  %v2356_v41 = vmul.f32 %v4233_v11, %v2312_v20  ;;  %v2439_v49 = vpop.f32.mrf.mxu2 }
 0x418   : > { %v2471_v0 = vmul.f32 %v4227_v19, %v2439_v49 }
 0x419   : > { %v2376_v35 = vadd.f32 %v4244_v7, %v2356_v41 }
 0x41a   : > { %v2491_v63 = vadd.f32 %v4239_v26, %v2471_v0 }
 0x41b   : > { %v2501_v42 = vadd.f32 %v2485_v24, %v2376_v35 }
 0x41d   : > { %v2517_v47 = vmax.f32 %v2501_v42, 0.0 }
 0x41e   : > { %v2315_v14 = vpop.f32.mrf.mxu1 }
 0x41f   : > { %2534 = vst.msk [vmem:[%s3472_s26 + $0x20] sm:$0xff] %vm2529_vm2, %v2517_v47  ;;  %v2357_v6 = vmul.f32 %v4233_v11, %v2315_v14  ;;  %v2442_v22 = vpop.f32.mrf.mxu2 }
 0x420   : > { %v2472_v53 = vmul.f32 %v4227_v19, %v2442_v22 }
 0x421   : > { %v2377_v16 = vadd.f32 %v4244_v7, %v2357_v6 }
 0x422   : > { %v2492_v61 = vadd.f32 %v4239_v26, %v2472_v53 }
 0x423   : > { %v2502_v40 = vadd.f32 %v2486_v13, %v2377_v16 }
 0x425   : > { %v2518_v58 = vmax.f32 %v2502_v40, 0.0 }
 0x426   : > { %v2318_v54 = vpop.f32.mrf.mxu1 }
 0x427   : > { %2535 = vst.msk [vmem:[%s3472_s26 + $0x28] sm:$0xff] %vm2529_vm2, %v2518_v58  ;;  %v2358_v25 = vmul.f32 %v4233_v11, %v2318_v54  ;;  %v2445_v52 = vpop.f32.mrf.mxu2 }
 0x428   : > { %v2473_v20 = vmul.f32 %v4227_v19, %v2445_v52 }
 0x429   : > { %v2378_v15 = vadd.f32 %v4244_v7, %v2358_v25 }
 0x42a   : > { %v2493_v42 = vadd.f32 %v4239_v26, %v2473_v20 }
 0x42b   : > { %v2503_v48 = vadd.f32 %v2487_v1, %v2378_v15 }
 0x42d   : > { %v2519_v9 = vmax.f32 %v2503_v48, 0.0 }
 0x42e   : > { %v2321_v36 = vpop.f32.mrf.mxu1 }
 0x42f   : > { %2536 = vst.msk [vmem:[%s3472_s26 + $0x30] sm:$0xff] %vm2529_vm2, %v2519_v9  ;;  %v2359_v56 = vmul.f32 %v4233_v11, %v2321_v36  ;;  %v2448_v41 = vpop.f32.mrf.mxu2 }
 0x430   : > { %v2474_v14 = vmul.f32 %v4227_v19, %v2448_v41 }
 0x431   : > { %v2379_v44 = vadd.f32 %v4244_v7, %v2359_v56 }
 0x432   : > { %v2494_v40 = vadd.f32 %v4239_v26, %v2474_v14 }
 0x433   : > { %v2504_v4 = vadd.f32 %v2488_v3, %v2379_v44 }
 0x435   : > { %v2520_v55 = vmax.f32 %v2504_v4, 0.0 }
 0x436   : > { %v2324_v39 = vpop.f32.mrf.mxu1 }
 0x437   : > { %2537 = vst.msk [vmem:[%s3472_s26 + $0x38] sm:$0xff] %vm2529_vm2, %v2520_v55  ;;  %v2360_v27 = vmul.f32 %v4233_v11, %v2324_v39  ;;  %v2451_v16 = vpop.f32.mrf.mxu2 }
 0x438   : > { %v2475_v54 = vmul.f32 %v4227_v19, %v2451_v16 }
 0x439   : > { %v2380_v28 = vadd.f32 %v4244_v7, %v2360_v27 }
 0x43a   : > { %v2495_v48 = vadd.f32 %v4239_v26, %v2475_v54 }
 0x43b   : > { %v2505_v31 = vadd.f32 %v2489_v33, %v2380_v28 }
 0x43d   : > { %v2521_v10 = vmax.f32 %v2505_v31, 0.0 }
 0x43e   : > { %v2327_v59 = vpop.f32.mrf.mxu1 }
 0x43f   : > { %2538 = vst.msk [vmem:[%s3472_s26 + $0x40] sm:$0xff] %vm2529_vm2, %v2521_v10  ;;  %v2361_v5 = vmul.f32 %v4233_v11, %v2327_v59  ;;  %v2454_v38 = vpop.f32.mrf.mxu2 }
 0x440   : > { %v2476_v36 = vmul.f32 %v4227_v19, %v2454_v38 }
 0x441   : > { %v2381_v60 = vadd.f32 %v4244_v7, %v2361_v5 }
 0x442   : > { %v2496_v4 = vadd.f32 %v4239_v26, %v2476_v36 }
 0x443   : > { %v2506_v43 = vadd.f32 %v2490_v62, %v2381_v60 }
 0x445   : > { %v2522_v45 = vmax.f32 %v2506_v43, 0.0 }
 0x446   : > { %v2330_v17 = vpop.f32.mrf.mxu1 }
 0x447   : > { %2539 = vst.msk [vmem:[%s3472_s26 + $0x48] sm:$0xff] %vm2529_vm2, %v2522_v45  ;;  %v2362_v34 = vmul.f32 %v4233_v11, %v2330_v17 }
 0x449   : > { %v2382_v51 = vadd.f32 %v4244_v7, %v2362_v34 }
 0x44b   : > { %v2507_v12 = vadd.f32 %v2491_v63, %v2382_v51 }
 0x44d   : > { %v2523_v50 = vmax.f32 %v2507_v12, 0.0 }
 0x44e   : > { %v2333_v32 = vpop.f32.mrf.mxu1 }
 0x44f   : > { %2540 = vst.msk [vmem:[%s3472_s26 + $0x50] sm:$0xff] %vm2529_vm2, %v2523_v50  ;;  %v2363_v18 = vmul.f32 %v4233_v11, %v2333_v32 }
 0x451   : > { %v2383_v2 = vadd.f32 %v4244_v7, %v2363_v18 }
 0x453   : > { %v2508_v21 = vadd.f32 %v2492_v61, %v2383_v2 }
 0x455   : > { %v2524_v24 = vmax.f32 %v2508_v21, 0.0 }
 0x456   : > { %v2336_v46 = vpop.f32.mrf.mxu1 }
 0x457   : > { %2541 = vst.msk [vmem:[%s3472_s26 + $0x58] sm:$0xff] %vm2529_vm2, %v2524_v24  ;;  %v2364_v35 = vmul.f32 %v4233_v11, %v2336_v46 }
 0x459   : > { %v2384_v8 = vadd.f32 %v4244_v7, %v2364_v35 }
 0x45b   : > { %v2509_v47 = vadd.f32 %v2493_v42, %v2384_v8 }
 0x45d   : > { %v2525_v6 = vmax.f32 %v2509_v47, 0.0 }
 0x45e   : > { %v2339_v13 = vpop.f32.mrf.mxu1 }
 0x45f   : > { %2542 = vst.msk [vmem:[%s3472_s26 + $0x60] sm:$0xff] %vm2529_vm2, %v2525_v6  ;;  %v2365_v37 = vmul.f32 %v4233_v11, %v2339_v13 }
 0x461   : > { %v2385_v29 = vadd.f32 %v4244_v7, %v2365_v37 }
 0x463   : > { %v2510_v58 = vadd.f32 %v2494_v40, %v2385_v29 }
 0x465   : > { %v2526_v25 = vmax.f32 %v2510_v58, 0.0 }
 0x466   : > { %v2342_v1 = vpop.f32.mrf.mxu1 }
 0x467   : > { %2543 = vst.msk [vmem:[%s3472_s26 + $0x68] sm:$0xff] %vm2529_vm2, %v2526_v25  ;;  %v2366_v15 = vmul.f32 %v4233_v11, %v2342_v1 }
 0x469   : > { %v2386_v57 = vadd.f32 %v4244_v7, %v2366_v15 }
 0x46b   : > { %v2511_v9 = vadd.f32 %v2495_v48, %v2386_v57 }
 0x46d   : > { %v2527_v56 = vmax.f32 %v2511_v9, 0.0 }
 0x46e   : > { %v2345_v3 = vpop.f32.mrf.mxu1 }
 0x46f   : > { %2544 = vst.msk [vmem:[%s3472_s26 + $0x70] sm:$0xff] %vm2529_vm2, %v2527_v56  ;;  %v2367_v44 = vmul.f32 %v4233_v11, %v2345_v3 }
 0x471   : > { %v2387_v23 = vadd.f32 %v4244_v7, %v2367_v44 }
 0x473   : > { %v2512_v19 = vadd.f32 %v2496_v4, %v2387_v23 }
 0x475   : > { %v2528_v55 = vmax.f32 %v2512_v19, 0.0 }
 0x477   : > { %2545 = vst.msk [vmem:[%s3472_s26 + $0x78] sm:$0xff] %vm2529_vm2, %v2528_v55 }
 0x478   : > { %3065 = shalt.err (!%p3062_p1)
}
 0x479   : > { %s3136_s27 = smov 128   ;;  %s3137_s26 = smov 8  }
 0x47a   : > { %2955 = dma.vmem_to_hbm [thread:$0]  (%p3269_p3), %s2563_s3, 2048, %s2565_s20, %s2547_s24, %s3136_s27, %s3136_s27, %s3137_s26  }
 0x47b PF: > { %s4486_s30 = sld [smem:[#allocation11_spill]] }
 0x47c   : > { %s4487_s22 = sld [smem:[#allocation6_spill]] }
 0x481   : > { %p2961_p2 = scmp.ge.s32.totalorder %s4486_s30, 2 }
 0x482   : > { %s2579_s16 = sand.u32 1, %s4487_s22  }
 0x483   : > { %p2958_p4 = pnand %p2961_p2, %p3278_p8  ;;  %s2580_s17 = scalar_lea.sflag [#allocation4], %s2579_s16 }
 0x485   : > { %p2959_p5 = pneg %p2958_p4 }
 0x487   : > { %3099 = dma.done.wait (%p2959_p5), %s2580_s17, 2048  }
 0x488   : > { %3101 = vsyncadd (%p2959_p5), %s2580_s17, 4294965248  ;;  %s28_s25 = sadd.s32 1, %s4486_s30   ;;  %s4489_s28 = sld [smem:[#allocation7_spill]] }
 0x489   : > { %p25_p6 = scmp.ge.s32.totalorder %s28_s25, 6   ;;  %s4490_s20 = sld [smem:[#allocation16_spill]] }
 0x48a   : > { %s4491_s21 = sld [smem:[#allocation9_spill]]  ;;  %s4495_s18 = smov %s3108_s19 }
 0x48b   : > { %s4492_s22 = sld [smem:[#allocation10_spill]]  ;;  %27 = sbr.rel (!%p25_p6) target bundleno = 9 (0x9), region = 145 }
 0x48c   : > { %s4493_s23 = sld [smem:[#allocation12_spill]] }
 0x48d   : > { %s4494_s24 = sld [smem:[#allocation14_spill]] }
 0x48e   : > { %s4496_s19 = smov %s4489_s28 }
 0x490   :  { %2586 = vsyncpa [#allocation4], 1 }
 0x491   :  { %2588 = vsyncpa [#allocation4 + $0x1], 1 }

</bundles_post_ra>
